<compile_context>
chip_gen: v7x
topology: tpu7x:2x2x1
jax: 0.10.0
libtpu: 0.0.40
codegen_flags: <defaults>
</compile_context>

<pallas_src>
import functools

import jax
import jax.numpy as jnp
from jax.experimental import pallas as pl
from jax.experimental.pallas import tpu as pltpu


def _sigmoid(x):
    # sigmoid(x) = 0.5 * tanh(0.5 * x) + 0.5  -> a single EUP (tanh) pass.
    return 0.5 * jnp.tanh(0.5 * x) + 0.5


# ----------------------------- fused kernel ----------------------------------

def _fused_lstm_kernel(*refs, layers, hidden, seq_len, batch_tile,
                       return_sequence, bulk_dtype):
    # refs = (x, [wih_t, whh_t, bias] * layers, wlin_t, blin, out,
    #         xproj_scratch, hseq_scratch)
    x_ref = refs[0]
    layer_refs = refs[1:1 + 3 * layers]
    wlin_ref = refs[1 + 3 * layers]
    blin_ref = refs[2 + 3 * layers]
    out_ref = refs[3 + 3 * layers]
    xproj_ref = refs[4 + 3 * layers]          # (T*TB, 4H) f32 VMEM scratch
    hseq_ref = refs[5 + 3 * layers]           # (T*TB, H)  f32 VMEM scratch

    H = hidden
    T = seq_len
    TB = batch_tile

    h = None
    for layer in range(layers):
        wih = layer_refs[3 * layer][...]       # (Din, 4H), bulk_dtype
        whh = layer_refs[3 * layer + 1][...]   # (H, 4H),  f32 (recurrent path)
        bias = layer_refs[3 * layer + 2][...]  # (1, 4H)   == b_ih + b_hh

        # ---- hoisted input projection: ONE MXU matmul over all timesteps ----
        if layer == 0:
            # (T, TB, I) time-major block -> flat (T*TB, I); TB is a sublane
            # multiple so the leading-dim merge is tile-aligned.
            xin = x_ref[...].reshape(T * TB, x_ref.shape[-1])
        else:
            xin = hseq_ref[...]                # already flat (T*TB, H)
        xproj_ref[...] = jnp.dot(xin.astype(bulk_dtype), wih,
                                 preferred_element_type=jnp.float32) + bias

        # ---- recurrence: only h @ W_hh + gate math is on the serial path ----
        # TODO(synk): for large T, switch to lax.fori_loop(..., unroll=k) and
        # hold W_hh on the MXU with pltpu.matmul_push_rhs / matmul_acc_lhs.
        h = jnp.zeros((TB, H), jnp.float32)
        c = jnp.zeros((TB, H), jnp.float32)
        for t in range(T):
            gates = xproj_ref[pl.ds(t * TB, TB), :] + jnp.dot(
                h, whh, preferred_element_type=jnp.float32)
            # Gate order is [i, f, o, g] after the wrapper-side column permute:
            # sigmoid over the first 3H columns, tanh only over the last H.
            sig = _sigmoid(gates[:, :3 * H])
            g_g = jnp.tanh(gates[:, 3 * H:])
            i_g = sig[:, 0 * H:1 * H]
            f_g = sig[:, 1 * H:2 * H]
            o_g = sig[:, 2 * H:3 * H]
            c = f_g * c + i_g * g_g
            h = o_g * jnp.tanh(c)
            hseq_ref[pl.ds(t * TB, TB), :] = h   # static-offset VMEM store

    # ---- fused linear head ----
    wlin = wlin_ref[...]                 # (H, O), bulk_dtype
    blin = blin_ref[...]                 # (1, O), f32
    if return_sequence:
        y = jnp.dot(hseq_ref[...].astype(bulk_dtype), wlin,
                    preferred_element_type=jnp.float32) + blin
        out_ref[...] = y.reshape(T, TB, -1).astype(out_ref.dtype)
    else:
        y = jnp.dot(h.astype(bulk_dtype), wlin,
                    preferred_element_type=jnp.float32) + blin
        out_ref[...] = y.astype(out_ref.dtype)


# ------------------------------ public wrapper --------------------------------

def lstm_forward(params, x, return_sequence=False, *, batch_tile=8,
                 bulk_dtype=jnp.bfloat16):
    """Forward pass equivalent to the PyTorch module. x: (B, T, n_input)."""
    x = jnp.asarray(x, jnp.float32)
    B, T, I = x.shape
    layers = len(params["lstm"])
    H = params["lstm"][0]["w_hh"].shape[1]
    O = params["linear"]["w"].shape[0]

    TB = min(batch_tile, B)
    assert B % TB == 0 and (TB % 8 == 0 or TB == B), (
        "batch tile must divide B and be a sublane multiple (or the full batch)")

    # Gate-column permutation [i | f | g | o] -> [i | f | o | g] so the kernel
    # can split sigmoid/tanh work without cross-lane shuffles.
    perm = jnp.concatenate([jnp.arange(0, 2 * H),
                            jnp.arange(3 * H, 4 * H),
                            jnp.arange(2 * H, 3 * H)])

    x_tm = jnp.transpose(x, (1, 0, 2))            # (T, B, I) time-major

    args = [x_tm]
    in_specs = [pl.BlockSpec((T, TB, I), lambda b: (0, b, 0))]
    for lp in params["lstm"]:
        wih = jnp.asarray(lp["w_ih"].T, jnp.float32)[:, perm].astype(bulk_dtype)
        whh = jnp.asarray(lp["w_hh"].T, jnp.float32)[:, perm]           # f32
        bias = jnp.asarray(lp["b_ih"] + lp["b_hh"], jnp.float32)[perm]
        bias = bias.reshape(1, 4 * H)
        for w in (wih, whh, bias):
            args.append(w)
            in_specs.append(pl.BlockSpec(w.shape, lambda b: (0, 0)))
    wlin = jnp.asarray(params["linear"]["w"].T, jnp.float32).astype(bulk_dtype)
    blin = jnp.asarray(params["linear"]["b"].reshape(1, O), jnp.float32)
    args += [wlin, blin]
    in_specs += [pl.BlockSpec(wlin.shape, lambda b: (0, 0)),
                 pl.BlockSpec(blin.shape, lambda b: (0, 0))]

    if return_sequence:
        out_shape = jax.ShapeDtypeStruct((T, B, O), jnp.float32)  # time-major
        out_spec = pl.BlockSpec((T, TB, O), lambda b: (0, b, 0))
    else:
        out_shape = jax.ShapeDtypeStruct((B, O), jnp.float32)
        out_spec = pl.BlockSpec((TB, O), lambda b: (b, 0))

    kernel = functools.partial(
        _fused_lstm_kernel, layers=layers, hidden=H, seq_len=T, batch_tile=TB,
        return_sequence=return_sequence, bulk_dtype=bulk_dtype)

    # TODO(synk): for production T/B/H, time-chunk the hoisted projection
    # (carried h/c, bf16 scratch) and set vmem_limit_bytes against v7x's
    # 64 MiB / v5e's 16 MiB default scoped VMEM.
    out = pl.pallas_call(
        kernel,
        out_shape=out_shape,
        grid_spec=pltpu.PrefetchScalarGridSpec(
            num_scalar_prefetch=0,
            grid=(B // TB,),
            in_specs=in_specs,
            out_specs=out_spec,
            scratch_shapes=[pltpu.VMEM((T * TB, 4 * H), jnp.float32),
                            pltpu.VMEM((T * TB, H), jnp.float32)]),
        compiler_params=pltpu.CompilerParams(
            dimension_semantics=("parallel",)),
    )(*args)

    if return_sequence:
        out = jnp.transpose(out, (1, 0, 2))   # back to batch-first (B, T, O)
    return out


# ------------------------------ params / init ---------------------------------

def init_lstm_params(key, n_input, n_hidden, n_output, layers):
    """PyTorch-like uniform(-1/sqrt(H), 1/sqrt(H)) init, deterministic."""
    k = 1.0 / jnp.sqrt(jnp.float32(n_hidden))
    params = {"lstm": [], "linear": None}
    for layer in range(layers):
        in_dim = n_input if layer == 0 else n_hidden
        key, k1, k2, k3, k4 = jax.random.split(key, 5)
        params["lstm"].append({
            "w_ih": jax.random.uniform(k1, (4 * n_hidden, in_dim), jnp.float32, -k, k),
            "w_hh": jax.random.uniform(k2, (4 * n_hidden, n_hidden), jnp.float32, -k, k),
            "b_ih": jax.random.uniform(k3, (4 * n_hidden,), jnp.float32, -k, k),
            "b_hh": jax.random.uniform(k4, (4 * n_hidden,), jnp.float32, -k, k),
        })
    key, k5, k6 = jax.random.split(key, 3)
    params["linear"] = {
        "w": jax.random.uniform(k5, (n_output, n_hidden), jnp.float32, -k, k),
        "b": jax.random.uniform(k6, (n_output,), jnp.float32, -k, k),
    }
    return params
    # TODO(synk): inter-layer dropout (training mode only) is not implemented;
    # this matches PyTorch semantics for dropout=0 / eval mode.


# --------------------------- Pure-JAX reference -------------------------------

def _ref_forward(params, x, return_sequence=False):
    h_seq = jnp.asarray(x, jnp.float32)
    B, T, _ = h_seq.shape
    for lp in params["lstm"]:
        H = lp["w_hh"].shape[1]
        h = jnp.zeros((B, H), jnp.float32)
        c = jnp.zeros((B, H), jnp.float32)
        outs = []
        for t in range(T):
            gates = (h_seq[:, t, :] @ lp["w_ih"].T + lp["b_ih"]
                     + h @ lp["w_hh"].T + lp["b_hh"])
            i_g = jax.nn.sigmoid(gates[:, 0 * H:1 * H])
            f_g = jax.nn.sigmoid(gates[:, 1 * H:2 * H])
            g_g = jnp.tanh(gates[:, 2 * H:3 * H])
            o_g = jax.nn.sigmoid(gates[:, 3 * H:4 * H])
            c = f_g * c + i_g * g_g
            h = o_g * jnp.tanh(c)
            outs.append(h)
        h_seq = jnp.stack(outs, axis=1)
    wl, bl = params["linear"]["w"], params["linear"]["b"]
    if return_sequence:
        return h_seq @ wl.T + bl
    return h_seq[:, -1, :] @ wl.T + bl


# ----------------------------------- main --------------------------------------

if __name__ == "__main__":
    n_input, n_hidden, n_output, layers = 16, 32, 4, 2
    B, T = 16, 8     # B=16 with TB=8 -> grid=(2,), exercises the batch-parallel axis

    key = jax.random.PRNGKey(0)
    pkey, xkey = jax.random.split(key)
    params = init_lstm_params(pkey, n_input, n_hidden, n_output, layers)
    x = jax.random.normal(xkey, (B, T, n_input), jnp.float32)

    y_ref = _ref_forward(params, x, return_sequence=False)
    y_seq_ref = _ref_forward(params, x, return_sequence=True)

    # --- exact-numerics path (f32 bulk matmuls): tight tolerance ---
    y32 = jax.block_until_ready(
        lstm_forward(params, x, return_sequence=False, bulk_dtype=jnp.float32))
    assert y32.shape == (B, n_output)
    assert jnp.allclose(y32, y_ref, atol=1e-4, rtol=1e-4), "mismatch (f32, last-step)"

    yseq32 = jax.block_until_ready(
        lstm_forward(params, x, return_sequence=True, bulk_dtype=jnp.float32))
    assert yseq32.shape == (B, T, n_output)
    assert jnp.allclose(yseq32, y_seq_ref, atol=1e-4, rtol=1e-4), "mismatch (f32, sequence)"

    # --- performance path (bf16 bulk matmuls, f32 accumulation) ---
    # bf16 operand rounding (~2^-9 relative) only touches the non-recurrent
    # matmuls; tolerance widened accordingly.
    ybf = jax.block_until_ready(
        lstm_forward(params, x, return_sequence=False, bulk_dtype=jnp.bfloat16))
    assert ybf.shape == (B, n_output)
    assert jnp.allclose(ybf, y_ref, atol=2e-2, rtol=2e-2), "mismatch (bf16, last-step)"

    yseqbf = jax.block_until_ready(
        lstm_forward(params, x, return_sequence=True, bulk_dtype=jnp.bfloat16))
    assert yseqbf.shape == (B, T, n_output)
    assert jnp.allclose(yseqbf, y_seq_ref, atol=2e-2, rtol=2e-2), "mismatch (bf16, sequence)"

    print("KERNEL_OK")
</pallas_src>

<mosaic_0001>
module attributes {stable_mosaic.version = 11 : i64} {
  func.func @_fused_lstm_kernel(%arg0: i32, %arg1: memref<8x8x16xf32, #tpu.memory_space<vmem>>, %arg2: memref<16x128xf32, #tpu.memory_space<vmem>>, %arg3: memref<32x128xf32, #tpu.memory_space<vmem>>, %arg4: memref<1x128xf32, #tpu.memory_space<vmem>>, %arg5: memref<32x128xf32, #tpu.memory_space<vmem>>, %arg6: memref<32x128xf32, #tpu.memory_space<vmem>>, %arg7: memref<1x128xf32, #tpu.memory_space<vmem>>, %arg8: memref<32x4xf32, #tpu.memory_space<vmem>>, %arg9: memref<1x4xf32, #tpu.memory_space<vmem>>, %arg10: memref<8x4xf32, #tpu.memory_space<vmem>>, %arg11: memref<64x128xf32, #tpu.memory_space<vmem>>, %arg12: memref<64x32xf32, #tpu.memory_space<vmem>>) attributes {dimension_semantics = [#tpu.dimension_semantics<parallel>], iteration_bounds = array<i64: 2>, scalar_prefetch = 0 : i64, scratch_operands = 2 : i64, tpu.core_type = #tpu.core_type<tc>, window_params = [{transform_indices = @transform_0, window_bounds = array<i64: 8, 8, 16>}, {pipeline_mode = #tpu.pipeline_mode<synchronous>, transform_indices = @transform_1, window_bounds = array<i64: 16, 128>}, {pipeline_mode = #tpu.pipeline_mode<synchronous>, transform_indices = @transform_2, window_bounds = array<i64: 32, 128>}, {pipeline_mode = #tpu.pipeline_mode<synchronous>, transform_indices = @transform_3, window_bounds = array<i64: 1, 128>}, {pipeline_mode = #tpu.pipeline_mode<synchronous>, transform_indices = @transform_4, window_bounds = array<i64: 32, 128>}, {pipeline_mode = #tpu.pipeline_mode<synchronous>, transform_indices = @transform_5, window_bounds = array<i64: 32, 128>}, {pipeline_mode = #tpu.pipeline_mode<synchronous>, transform_indices = @transform_6, window_bounds = array<i64: 1, 128>}, {pipeline_mode = #tpu.pipeline_mode<synchronous>, transform_indices = @transform_7, window_bounds = array<i64: 32, 4>}, {pipeline_mode = #tpu.pipeline_mode<synchronous>, transform_indices = @transform_8, window_bounds = array<i64: 1, 4>}, {transform_indices = @transform_9, window_bounds = array<i64: 8, 4>}]} {
    %c0 = arith.constant 0 : index
    %c0_0 = arith.constant 0 : index
    %0 = vector.load %arg2[%c0, %c0_0] : memref<16x128xf32, #tpu.memory_space<vmem>>, vector<16x128xf32>
    %c0_1 = arith.constant 0 : index
    %c0_2 = arith.constant 0 : index
    %1 = vector.load %arg3[%c0_1, %c0_2] : memref<32x128xf32, #tpu.memory_space<vmem>>, vector<32x128xf32>
    %c0_3 = arith.constant 0 : index
    %c0_4 = arith.constant 0 : index
    %2 = vector.load %arg4[%c0_3, %c0_4] : memref<1x128xf32, #tpu.memory_space<vmem>>, vector<1x128xf32>
    %c0_5 = arith.constant 0 : index
    %c0_6 = arith.constant 0 : index
    %c0_7 = arith.constant 0 : index
    %3 = vector.load %arg1[%c0_5, %c0_6, %c0_7] : memref<8x8x16xf32, #tpu.memory_space<vmem>>, vector<8x8x16xf32>
    %4 = vector.shape_cast %3 : vector<8x8x16xf32> to vector<64x16xf32>
    %cst = arith.constant dense<0.000000e+00> : vector<64x128xf32>
    %5 = tpu.matmul %4, %0, %cst {dimension_numbers = #tpu.dot_dimension_numbers<[1], [0], [0], [1], [0, 0, 1, 1], [], []>} : vector<64x16xf32>, vector<16x128xf32>, vector<64x128xf32> -> vector<64x128xf32>
    %6 = vector.broadcast %2 : vector<1x128xf32> to vector<64x128xf32>
    %7 = arith.addf %5, %6 : vector<64x128xf32>
    %c0_8 = arith.constant 0 : index
    %c0_9 = arith.constant 0 : index
    %8 = vector.load %arg11[%c0_8, %c0_9] : memref<64x128xf32, #tpu.memory_space<vmem>>, vector<64x128xf32>
    tpu.vector_store %arg11[%c0_8, %c0_9], %7 {strides = array<i32>} : memref<64x128xf32, #tpu.memory_space<vmem>>, vector<64x128xf32>,
    %cst_10 = arith.constant 0.000000e+00 : f32
    %9 = vector.broadcast %cst_10 : f32 to vector<8x32xf32>
    %cst_11 = arith.constant 0.000000e+00 : f32
    %10 = vector.broadcast %cst_11 : f32 to vector<8x32xf32>
    %c0_12 = arith.constant 0 : index
    %c0_13 = arith.constant 0 : index
    %11 = vector.load %arg11[%c0_12, %c0_13] : memref<64x128xf32, #tpu.memory_space<vmem>>, vector<8x128xf32>
    %cst_14 = arith.constant dense<0.000000e+00> : vector<8x128xf32>
    %12 = tpu.matmul %9, %1, %cst_14 {dimension_numbers = #tpu.dot_dimension_numbers<[1], [0], [0], [1], [0, 0, 1, 1], [], []>} : vector<8x32xf32>, vector<32x128xf32>, vector<8x128xf32> -> vector<8x128xf32>
    %13 = arith.addf %11, %12 : vector<8x128xf32>
    %14 = vector.extract_strided_slice %13 {offsets = [0, 0], sizes = [8, 96], strides = [1, 1]} : vector<8x128xf32> to vector<8x96xf32>
    %cst_15 = arith.constant 5.000000e-01 : f32
    %15 = vector.broadcast %cst_15 : f32 to vector<8x96xf32>
    %16 = arith.mulf %15, %14 : vector<8x96xf32>
    %17 = math.tanh %16 : vector<8x96xf32>
    %cst_16 = arith.constant 5.000000e-01 : f32
    %18 = vector.broadcast %cst_16 : f32 to vector<8x96xf32>
    %19 = arith.mulf %18, %17 : vector<8x96xf32>
    %cst_17 = arith.constant 5.000000e-01 : f32
    %20 = vector.broadcast %cst_17 : f32 to vector<8x96xf32>
    %21 = arith.addf %19, %20 : vector<8x96xf32>
    %22 = vector.extract_strided_slice %13 {offsets = [0, 96], sizes = [8, 32], strides = [1, 1]} : vector<8x128xf32> to vector<8x32xf32>
    %23 = math.tanh %22 : vector<8x32xf32>
    %24 = vector.extract_strided_slice %21 {offsets = [0, 0], sizes = [8, 32], strides = [1, 1]} : vector<8x96xf32> to vector<8x32xf32>
    %25 = vector.extract_strided_slice %21 {offsets = [0, 32], sizes = [8, 32], strides = [1, 1]} : vector<8x96xf32> to vector<8x32xf32>
    %26 = vector.extract_strided_slice %21 {offsets = [0, 64], sizes = [8, 32], strides = [1, 1]} : vector<8x96xf32> to vector<8x32xf32>
    %27 = arith.mulf %25, %10 : vector<8x32xf32>
    %28 = arith.mulf %24, %23 : vector<8x32xf32>
    %29 = arith.addf %27, %28 : vector<8x32xf32>
    %30 = math.tanh %29 : vector<8x32xf32>
    %31 = arith.mulf %26, %30 : vector<8x32xf32>
    %c0_18 = arith.constant 0 : index
    %c0_19 = arith.constant 0 : index
    %32 = vector.load %arg12[%c0_18, %c0_19] : memref<64x32xf32, #tpu.memory_space<vmem>>, vector<8x32xf32>
    tpu.vector_store %arg12[%c0_18, %c0_19], %31 {strides = array<i32>} : memref<64x32xf32, #tpu.memory_space<vmem>>, vector<8x32xf32>,
    %c8 = arith.constant 8 : index
    %c0_20 = arith.constant 0 : index
    %33 = vector.load %arg11[%c8, %c0_20] : memref<64x128xf32, #tpu.memory_space<vmem>>, vector<8x128xf32>
    %cst_21 = arith.constant dense<0.000000e+00> : vector<8x128xf32>
    %34 = tpu.matmul %31, %1, %cst_21 {dimension_numbers = #tpu.dot_dimension_numbers<[1], [0], [0], [1], [0, 0, 1, 1], [], []>} : vector<8x32xf32>, vector<32x128xf32>, vector<8x128xf32> -> vector<8x128xf32>
    %35 = arith.addf %33, %34 : vector<8x128xf32>
    %36 = vector.extract_strided_slice %35 {offsets = [0, 0], sizes = [8, 96], strides = [1, 1]} : vector<8x128xf32> to vector<8x96xf32>
    %cst_22 = arith.constant 5.000000e-01 : f32
    %37 = vector.broadcast %cst_22 : f32 to vector<8x96xf32>
    %38 = arith.mulf %37, %36 : vector<8x96xf32>
    %39 = math.tanh %38 : vector<8x96xf32>
    %cst_23 = arith.constant 5.000000e-01 : f32
    %40 = vector.broadcast %cst_23 : f32 to vector<8x96xf32>
    %41 = arith.mulf %40, %39 : vector<8x96xf32>
    %cst_24 = arith.constant 5.000000e-01 : f32
    %42 = vector.broadcast %cst_24 : f32 to vector<8x96xf32>
    %43 = arith.addf %41, %42 : vector<8x96xf32>
    %44 = vector.extract_strided_slice %35 {offsets = [0, 96], sizes = [8, 32], strides = [1, 1]} : vector<8x128xf32> to vector<8x32xf32>
    %45 = math.tanh %44 : vector<8x32xf32>
    %46 = vector.extract_strided_slice %43 {offsets = [0, 0], sizes = [8, 32], strides = [1, 1]} : vector<8x96xf32> to vector<8x32xf32>
    %47 = vector.extract_strided_slice %43 {offsets = [0, 32], sizes = [8, 32], strides = [1, 1]} : vector<8x96xf32> to vector<8x32xf32>
    %48 = vector.extract_strided_slice %43 {offsets = [0, 64], sizes = [8, 32], strides = [1, 1]} : vector<8x96xf32> to vector<8x32xf32>
    %49 = arith.mulf %47, %29 : vector<8x32xf32>
    %50 = arith.mulf %46, %45 : vector<8x32xf32>
    %51 = arith.addf %49, %50 : vector<8x32xf32>
    %52 = math.tanh %51 : vector<8x32xf32>
    %53 = arith.mulf %48, %52 : vector<8x32xf32>
    %c8_25 = arith.constant 8 : index
    %c0_26 = arith.constant 0 : index
    %54 = vector.load %arg12[%c8_25, %c0_26] : memref<64x32xf32, #tpu.memory_space<vmem>>, vector<8x32xf32>
    tpu.vector_store %arg12[%c8_25, %c0_26], %53 {strides = array<i32>} : memref<64x32xf32, #tpu.memory_space<vmem>>, vector<8x32xf32>,
    %c16 = arith.constant 16 : index
    %c0_27 = arith.constant 0 : index
    %55 = vector.load %arg11[%c16, %c0_27] : memref<64x128xf32, #tpu.memory_space<vmem>>, vector<8x128xf32>
    %cst_28 = arith.constant dense<0.000000e+00> : vector<8x128xf32>
    %56 = tpu.matmul %53, %1, %cst_28 {dimension_numbers = #tpu.dot_dimension_numbers<[1], [0], [0], [1], [0, 0, 1, 1], [], []>} : vector<8x32xf32>, vector<32x128xf32>, vector<8x128xf32> -> vector<8x128xf32>
    %57 = arith.addf %55, %56 : vector<8x128xf32>
    %58 = vector.extract_strided_slice %57 {offsets = [0, 0], sizes = [8, 96], strides = [1, 1]} : vector<8x128xf32> to vector<8x96xf32>
    %cst_29 = arith.constant 5.000000e-01 : f32
    %59 = vector.broadcast %cst_29 : f32 to vector<8x96xf32>
    %60 = arith.mulf %59, %58 : vector<8x96xf32>
    %61 = math.tanh %60 : vector<8x96xf32>
    %cst_30 = arith.constant 5.000000e-01 : f32
    %62 = vector.broadcast %cst_30 : f32 to vector<8x96xf32>
    %63 = arith.mulf %62, %61 : vector<8x96xf32>
    %cst_31 = arith.constant 5.000000e-01 : f32
    %64 = vector.broadcast %cst_31 : f32 to vector<8x96xf32>
    %65 = arith.addf %63, %64 : vector<8x96xf32>
    %66 = vector.extract_strided_slice %57 {offsets = [0, 96], sizes = [8, 32], strides = [1, 1]} : vector<8x128xf32> to vector<8x32xf32>
    %67 = math.tanh %66 : vector<8x32xf32>
    %68 = vector.extract_strided_slice %65 {offsets = [0, 0], sizes = [8, 32], strides = [1, 1]} : vector<8x96xf32> to vector<8x32xf32>
    %69 = vector.extract_strided_slice %65 {offsets = [0, 32], sizes = [8, 32], strides = [1, 1]} : vector<8x96xf32> to vector<8x32xf32>
    %70 = vector.extract_strided_slice %65 {offsets = [0, 64], sizes = [8, 32], strides = [1, 1]} : vector<8x96xf32> to vector<8x32xf32>
    %71 = arith.mulf %69, %51 : vector<8x32xf32>
    %72 = arith.mulf %68, %67 : vector<8x32xf32>
    %73 = arith.addf %71, %72 : vector<8x32xf32>
    %74 = math.tanh %73 : vector<8x32xf32>
    %75 = arith.mulf %70, %74 : vector<8x32xf32>
    %c16_32 = arith.constant 16 : index
    %c0_33 = arith.constant 0 : index
    %76 = vector.load %arg12[%c16_32, %c0_33] : memref<64x32xf32, #tpu.memory_space<vmem>>, vector<8x32xf32>
    tpu.vector_store %arg12[%c16_32, %c0_33], %75 {strides = array<i32>} : memref<64x32xf32, #tpu.memory_space<vmem>>, vector<8x32xf32>,
    %c24 = arith.constant 24 : index
    %c0_34 = arith.constant 0 : index
    %77 = vector.load %arg11[%c24, %c0_34] : memref<64x128xf32, #tpu.memory_space<vmem>>, vector<8x128xf32>
    %cst_35 = arith.constant dense<0.000000e+00> : vector<8x128xf32>
    %78 = tpu.matmul %75, %1, %cst_35 {dimension_numbers = #tpu.dot_dimension_numbers<[1], [0], [0], [1], [0, 0, 1, 1], [], []>} : vector<8x32xf32>, vector<32x128xf32>, vector<8x128xf32> -> vector<8x128xf32>
    %79 = arith.addf %77, %78 : vector<8x128xf32>
    %80 = vector.extract_strided_slice %79 {offsets = [0, 0], sizes = [8, 96], strides = [1, 1]} : vector<8x128xf32> to vector<8x96xf32>
    %cst_36 = arith.constant 5.000000e-01 : f32
    %81 = vector.broadcast %cst_36 : f32 to vector<8x96xf32>
    %82 = arith.mulf %81, %80 : vector<8x96xf32>
    %83 = math.tanh %82 : vector<8x96xf32>
    %cst_37 = arith.constant 5.000000e-01 : f32
    %84 = vector.broadcast %cst_37 : f32 to vector<8x96xf32>
    %85 = arith.mulf %84, %83 : vector<8x96xf32>
    %cst_38 = arith.constant 5.000000e-01 : f32
    %86 = vector.broadcast %cst_38 : f32 to vector<8x96xf32>
    %87 = arith.addf %85, %86 : vector<8x96xf32>
    %88 = vector.extract_strided_slice %79 {offsets = [0, 96], sizes = [8, 32], strides = [1, 1]} : vector<8x128xf32> to vector<8x32xf32>
    %89 = math.tanh %88 : vector<8x32xf32>
    %90 = vector.extract_strided_slice %87 {offsets = [0, 0], sizes = [8, 32], strides = [1, 1]} : vector<8x96xf32> to vector<8x32xf32>
    %91 = vector.extract_strided_slice %87 {offsets = [0, 32], sizes = [8, 32], strides = [1, 1]} : vector<8x96xf32> to vector<8x32xf32>
    %92 = vector.extract_strided_slice %87 {offsets = [0, 64], sizes = [8, 32], strides = [1, 1]} : vector<8x96xf32> to vector<8x32xf32>
    %93 = arith.mulf %91, %73 : vector<8x32xf32>
    %94 = arith.mulf %90, %89 : vector<8x32xf32>
    %95 = arith.addf %93, %94 : vector<8x32xf32>
    %96 = math.tanh %95 : vector<8x32xf32>
    %97 = arith.mulf %92, %96 : vector<8x32xf32>
    %c24_39 = arith.constant 24 : index
    %c0_40 = arith.constant 0 : index
    %98 = vector.load %arg12[%c24_39, %c0_40] : memref<64x32xf32, #tpu.memory_space<vmem>>, vector<8x32xf32>
    tpu.vector_store %arg12[%c24_39, %c0_40], %97 {strides = array<i32>} : memref<64x32xf32, #tpu.memory_space<vmem>>, vector<8x32xf32>,
    %c32 = arith.constant 32 : index
    %c0_41 = arith.constant 0 : index
    %99 = vector.load %arg11[%c32, %c0_41] : memref<64x128xf32, #tpu.memory_space<vmem>>, vector<8x128xf32>
    %cst_42 = arith.constant dense<0.000000e+00> : vector<8x128xf32>
    %100 = tpu.matmul %97, %1, %cst_42 {dimension_numbers = #tpu.dot_dimension_numbers<[1], [0], [0], [1], [0, 0, 1, 1], [], []>} : vector<8x32xf32>, vector<32x128xf32>, vector<8x128xf32> -> vector<8x128xf32>
    %101 = arith.addf %99, %100 : vector<8x128xf32>
    %102 = vector.extract_strided_slice %101 {offsets = [0, 0], sizes = [8, 96], strides = [1, 1]} : vector<8x128xf32> to vector<8x96xf32>
    %cst_43 = arith.constant 5.000000e-01 : f32
    %103 = vector.broadcast %cst_43 : f32 to vector<8x96xf32>
    %104 = arith.mulf %103, %102 : vector<8x96xf32>
    %105 = math.tanh %104 : vector<8x96xf32>
    %cst_44 = arith.constant 5.000000e-01 : f32
    %106 = vector.broadcast %cst_44 : f32 to vector<8x96xf32>
    %107 = arith.mulf %106, %105 : vector<8x96xf32>
    %cst_45 = arith.constant 5.000000e-01 : f32
    %108 = vector.broadcast %cst_45 : f32 to vector<8x96xf32>
    %109 = arith.addf %107, %108 : vector<8x96xf32>
    %110 = vector.extract_strided_slice %101 {offsets = [0, 96], sizes = [8, 32], strides = [1, 1]} : vector<8x128xf32> to vector<8x32xf32>
    %111 = math.tanh %110 : vector<8x32xf32>
    %112 = vector.extract_strided_slice %109 {offsets = [0, 0], sizes = [8, 32], strides = [1, 1]} : vector<8x96xf32> to vector<8x32xf32>
    %113 = vector.extract_strided_slice %109 {offsets = [0, 32], sizes = [8, 32], strides = [1, 1]} : vector<8x96xf32> to vector<8x32xf32>
    %114 = vector.extract_strided_slice %109 {offsets = [0, 64], sizes = [8, 32], strides = [1, 1]} : vector<8x96xf32> to vector<8x32xf32>
    %115 = arith.mulf %113, %95 : vector<8x32xf32>
    %116 = arith.mulf %112, %111 : vector<8x32xf32>
    %117 = arith.addf %115, %116 : vector<8x32xf32>
    %118 = math.tanh %117 : vector<8x32xf32>
    %119 = arith.mulf %114, %118 : vector<8x32xf32>
    %c32_46 = arith.constant 32 : index
    %c0_47 = arith.constant 0 : index
    %120 = vector.load %arg12[%c32_46, %c0_47] : memref<64x32xf32, #tpu.memory_space<vmem>>, vector<8x32xf32>
    tpu.vector_store %arg12[%c32_46, %c0_47], %119 {strides = array<i32>} : memref<64x32xf32, #tpu.memory_space<vmem>>, vector<8x32xf32>,
    %c40 = arith.constant 40 : index
    %c0_48 = arith.constant 0 : index
    %121 = vector.load %arg11[%c40, %c0_48] : memref<64x128xf32, #tpu.memory_space<vmem>>, vector<8x128xf32>
    %cst_49 = arith.constant dense<0.000000e+00> : vector<8x128xf32>
    %122 = tpu.matmul %119, %1, %cst_49 {dimension_numbers = #tpu.dot_dimension_numbers<[1], [0], [0], [1], [0, 0, 1, 1], [], []>} : vector<8x32xf32>, vector<32x128xf32>, vector<8x128xf32> -> vector<8x128xf32>
    %123 = arith.addf %121, %122 : vector<8x128xf32>
    %124 = vector.extract_strided_slice %123 {offsets = [0, 0], sizes = [8, 96], strides = [1, 1]} : vector<8x128xf32> to vector<8x96xf32>
    %cst_50 = arith.constant 5.000000e-01 : f32
    %125 = vector.broadcast %cst_50 : f32 to vector<8x96xf32>
    %126 = arith.mulf %125, %124 : vector<8x96xf32>
    %127 = math.tanh %126 : vector<8x96xf32>
    %cst_51 = arith.constant 5.000000e-01 : f32
    %128 = vector.broadcast %cst_51 : f32 to vector<8x96xf32>
    %129 = arith.mulf %128, %127 : vector<8x96xf32>
    %cst_52 = arith.constant 5.000000e-01 : f32
    %130 = vector.broadcast %cst_52 : f32 to vector<8x96xf32>
    %131 = arith.addf %129, %130 : vector<8x96xf32>
    %132 = vector.extract_strided_slice %123 {offsets = [0, 96], sizes = [8, 32], strides = [1, 1]} : vector<8x128xf32> to vector<8x32xf32>
    %133 = math.tanh %132 : vector<8x32xf32>
    %134 = vector.extract_strided_slice %131 {offsets = [0, 0], sizes = [8, 32], strides = [1, 1]} : vector<8x96xf32> to vector<8x32xf32>
    %135 = vector.extract_strided_slice %131 {offsets = [0, 32], sizes = [8, 32], strides = [1, 1]} : vector<8x96xf32> to vector<8x32xf32>
    %136 = vector.extract_strided_slice %131 {offsets = [0, 64], sizes = [8, 32], strides = [1, 1]} : vector<8x96xf32> to vector<8x32xf32>
    %137 = arith.mulf %135, %117 : vector<8x32xf32>
    %138 = arith.mulf %134, %133 : vector<8x32xf32>
    %139 = arith.addf %137, %138 : vector<8x32xf32>
    %140 = math.tanh %139 : vector<8x32xf32>
    %141 = arith.mulf %136, %140 : vector<8x32xf32>
    %c40_53 = arith.constant 40 : index
    %c0_54 = arith.constant 0 : index
    %142 = vector.load %arg12[%c40_53, %c0_54] : memref<64x32xf32, #tpu.memory_space<vmem>>, vector<8x32xf32>
    tpu.vector_store %arg12[%c40_53, %c0_54], %141 {strides = array<i32>} : memref<64x32xf32, #tpu.memory_space<vmem>>, vector<8x32xf32>,
    %c48 = arith.constant 48 : index
    %c0_55 = arith.constant 0 : index
    %143 = vector.load %arg11[%c48, %c0_55] : memref<64x128xf32, #tpu.memory_space<vmem>>, vector<8x128xf32>
    %cst_56 = arith.constant dense<0.000000e+00> : vector<8x128xf32>
    %144 = tpu.matmul %141, %1, %cst_56 {dimension_numbers = #tpu.dot_dimension_numbers<[1], [0], [0], [1], [0, 0, 1, 1], [], []>} : vector<8x32xf32>, vector<32x128xf32>, vector<8x128xf32> -> vector<8x128xf32>
    %145 = arith.addf %143, %144 : vector<8x128xf32>
    %146 = vector.extract_strided_slice %145 {offsets = [0, 0], sizes = [8, 96], strides = [1, 1]} : vector<8x128xf32> to vector<8x96xf32>
    %cst_57 = arith.constant 5.000000e-01 : f32
    %147 = vector.broadcast %cst_57 : f32 to vector<8x96xf32>
    %148 = arith.mulf %147, %146 : vector<8x96xf32>
    %149 = math.tanh %148 : vector<8x96xf32>
    %cst_58 = arith.constant 5.000000e-01 : f32
    %150 = vector.broadcast %cst_58 : f32 to vector<8x96xf32>
    %151 = arith.mulf %150, %149 : vector<8x96xf32>
    %cst_59 = arith.constant 5.000000e-01 : f32
    %152 = vector.broadcast %cst_59 : f32 to vector<8x96xf32>
    %153 = arith.addf %151, %152 : vector<8x96xf32>
    %154 = vector.extract_strided_slice %145 {offsets = [0, 96], sizes = [8, 32], strides = [1, 1]} : vector<8x128xf32> to vector<8x32xf32>
    %155 = math.tanh %154 : vector<8x32xf32>
    %156 = vector.extract_strided_slice %153 {offsets = [0, 0], sizes = [8, 32], strides = [1, 1]} : vector<8x96xf32> to vector<8x32xf32>
    %157 = vector.extract_strided_slice %153 {offsets = [0, 32], sizes = [8, 32], strides = [1, 1]} : vector<8x96xf32> to vector<8x32xf32>
    %158 = vector.extract_strided_slice %153 {offsets = [0, 64], sizes = [8, 32], strides = [1, 1]} : vector<8x96xf32> to vector<8x32xf32>
    %159 = arith.mulf %157, %139 : vector<8x32xf32>
    %160 = arith.mulf %156, %155 : vector<8x32xf32>
    %161 = arith.addf %159, %160 : vector<8x32xf32>
    %162 = math.tanh %161 : vector<8x32xf32>
    %163 = arith.mulf %158, %162 : vector<8x32xf32>
    %c48_60 = arith.constant 48 : index
    %c0_61 = arith.constant 0 : index
    %164 = vector.load %arg12[%c48_60, %c0_61] : memref<64x32xf32, #tpu.memory_space<vmem>>, vector<8x32xf32>
    tpu.vector_store %arg12[%c48_60, %c0_61], %163 {strides = array<i32>} : memref<64x32xf32, #tpu.memory_space<vmem>>, vector<8x32xf32>,
    %c56 = arith.constant 56 : index
    %c0_62 = arith.constant 0 : index
    %165 = vector.load %arg11[%c56, %c0_62] : memref<64x128xf32, #tpu.memory_space<vmem>>, vector<8x128xf32>
    %cst_63 = arith.constant dense<0.000000e+00> : vector<8x128xf32>
    %166 = tpu.matmul %163, %1, %cst_63 {dimension_numbers = #tpu.dot_dimension_numbers<[1], [0], [0], [1], [0, 0, 1, 1], [], []>} : vector<8x32xf32>, vector<32x128xf32>, vector<8x128xf32> -> vector<8x128xf32>
    %167 = arith.addf %165, %166 : vector<8x128xf32>
    %168 = vector.extract_strided_slice %167 {offsets = [0, 0], sizes = [8, 96], strides = [1, 1]} : vector<8x128xf32> to vector<8x96xf32>
    %cst_64 = arith.constant 5.000000e-01 : f32
    %169 = vector.broadcast %cst_64 : f32 to vector<8x96xf32>
    %170 = arith.mulf %169, %168 : vector<8x96xf32>
    %171 = math.tanh %170 : vector<8x96xf32>
    %cst_65 = arith.constant 5.000000e-01 : f32
    %172 = vector.broadcast %cst_65 : f32 to vector<8x96xf32>
    %173 = arith.mulf %172, %171 : vector<8x96xf32>
    %cst_66 = arith.constant 5.000000e-01 : f32
    %174 = vector.broadcast %cst_66 : f32 to vector<8x96xf32>
    %175 = arith.addf %173, %174 : vector<8x96xf32>
    %176 = vector.extract_strided_slice %167 {offsets = [0, 96], sizes = [8, 32], strides = [1, 1]} : vector<8x128xf32> to vector<8x32xf32>
    %177 = math.tanh %176 : vector<8x32xf32>
    %178 = vector.extract_strided_slice %175 {offsets = [0, 0], sizes = [8, 32], strides = [1, 1]} : vector<8x96xf32> to vector<8x32xf32>
    %179 = vector.extract_strided_slice %175 {offsets = [0, 32], sizes = [8, 32], strides = [1, 1]} : vector<8x96xf32> to vector<8x32xf32>
    %180 = vector.extract_strided_slice %175 {offsets = [0, 64], sizes = [8, 32], strides = [1, 1]} : vector<8x96xf32> to vector<8x32xf32>
    %181 = arith.mulf %179, %161 : vector<8x32xf32>
    %182 = arith.mulf %178, %177 : vector<8x32xf32>
    %183 = arith.addf %181, %182 : vector<8x32xf32>
    %184 = math.tanh %183 : vector<8x32xf32>
    %185 = arith.mulf %180, %184 : vector<8x32xf32>
    %c56_67 = arith.constant 56 : index
    %c0_68 = arith.constant 0 : index
    %186 = vector.load %arg12[%c56_67, %c0_68] : memref<64x32xf32, #tpu.memory_space<vmem>>, vector<8x32xf32>
    tpu.vector_store %arg12[%c56_67, %c0_68], %185 {strides = array<i32>} : memref<64x32xf32, #tpu.memory_space<vmem>>, vector<8x32xf32>,
    %c0_69 = arith.constant 0 : index
    %c0_70 = arith.constant 0 : index
    %187 = vector.load %arg5[%c0_69, %c0_70] : memref<32x128xf32, #tpu.memory_space<vmem>>, vector<32x128xf32>
    %c0_71 = arith.constant 0 : index
    %c0_72 = arith.constant 0 : index
    %188 = vector.load %arg6[%c0_71, %c0_72] : memref<32x128xf32, #tpu.memory_space<vmem>>, vector<32x128xf32>
    %c0_73 = arith.constant 0 : index
    %c0_74 = arith.constant 0 : index
    %189 = vector.load %arg7[%c0_73, %c0_74] : memref<1x128xf32, #tpu.memory_space<vmem>>, vector<1x128xf32>
    %c0_75 = arith.constant 0 : index
    %c0_76 = arith.constant 0 : index
    %190 = vector.load %arg12[%c0_75, %c0_76] : memref<64x32xf32, #tpu.memory_space<vmem>>, vector<64x32xf32>
    %cst_77 = arith.constant dense<0.000000e+00> : vector<64x128xf32>
    %191 = tpu.matmul %190, %187, %cst_77 {dimension_numbers = #tpu.dot_dimension_numbers<[1], [0], [0], [1], [0, 0, 1, 1], [], []>} : vector<64x32xf32>, vector<32x128xf32>, vector<64x128xf32> -> vector<64x128xf32>
    %192 = vector.broadcast %189 : vector<1x128xf32> to vector<64x128xf32>
    %193 = arith.addf %191, %192 : vector<64x128xf32>
    %c0_78 = arith.constant 0 : index
    %c0_79 = arith.constant 0 : index
    %194 = vector.load %arg11[%c0_78, %c0_79] : memref<64x128xf32, #tpu.memory_space<vmem>>, vector<64x128xf32>
    tpu.vector_store %arg11[%c0_78, %c0_79], %193 {strides = array<i32>} : memref<64x128xf32, #tpu.memory_space<vmem>>, vector<64x128xf32>,
    %cst_80 = arith.constant 0.000000e+00 : f32
    %195 = vector.broadcast %cst_80 : f32 to vector<8x32xf32>
    %cst_81 = arith.constant 0.000000e+00 : f32
    %196 = vector.broadcast %cst_81 : f32 to vector<8x32xf32>
    %c0_82 = arith.constant 0 : index
    %c0_83 = arith.constant 0 : index
    %197 = vector.load %arg11[%c0_82, %c0_83] : memref<64x128xf32, #tpu.memory_space<vmem>>, vector<8x128xf32>
    %cst_84 = arith.constant dense<0.000000e+00> : vector<8x128xf32>
    %198 = tpu.matmul %195, %188, %cst_84 {dimension_numbers = #tpu.dot_dimension_numbers<[1], [0], [0], [1], [0, 0, 1, 1], [], []>} : vector<8x32xf32>, vector<32x128xf32>, vector<8x128xf32> -> vector<8x128xf32>
    %199 = arith.addf %197, %198 : vector<8x128xf32>
    %200 = vector.extract_strided_slice %199 {offsets = [0, 0], sizes = [8, 96], strides = [1, 1]} : vector<8x128xf32> to vector<8x96xf32>
    %cst_85 = arith.constant 5.000000e-01 : f32
    %201 = vector.broadcast %cst_85 : f32 to vector<8x96xf32>
    %202 = arith.mulf %201, %200 : vector<8x96xf32>
    %203 = math.tanh %202 : vector<8x96xf32>
    %cst_86 = arith.constant 5.000000e-01 : f32
    %204 = vector.broadcast %cst_86 : f32 to vector<8x96xf32>
    %205 = arith.mulf %204, %203 : vector<8x96xf32>
    %cst_87 = arith.constant 5.000000e-01 : f32
    %206 = vector.broadcast %cst_87 : f32 to vector<8x96xf32>
    %207 = arith.addf %205, %206 : vector<8x96xf32>
    %208 = vector.extract_strided_slice %199 {offsets = [0, 96], sizes = [8, 32], strides = [1, 1]} : vector<8x128xf32> to vector<8x32xf32>
    %209 = math.tanh %208 : vector<8x32xf32>
    %210 = vector.extract_strided_slice %207 {offsets = [0, 0], sizes = [8, 32], strides = [1, 1]} : vector<8x96xf32> to vector<8x32xf32>
    %211 = vector.extract_strided_slice %207 {offsets = [0, 32], sizes = [8, 32], strides = [1, 1]} : vector<8x96xf32> to vector<8x32xf32>
    %212 = vector.extract_strided_slice %207 {offsets = [0, 64], sizes = [8, 32], strides = [1, 1]} : vector<8x96xf32> to vector<8x32xf32>
    %213 = arith.mulf %211, %196 : vector<8x32xf32>
    %214 = arith.mulf %210, %209 : vector<8x32xf32>
    %215 = arith.addf %213, %214 : vector<8x32xf32>
    %216 = math.tanh %215 : vector<8x32xf32>
    %217 = arith.mulf %212, %216 : vector<8x32xf32>
    %c0_88 = arith.constant 0 : index
    %c0_89 = arith.constant 0 : index
    %218 = vector.load %arg12[%c0_88, %c0_89] : memref<64x32xf32, #tpu.memory_space<vmem>>, vector<8x32xf32>
    tpu.vector_store %arg12[%c0_88, %c0_89], %217 {strides = array<i32>} : memref<64x32xf32, #tpu.memory_space<vmem>>, vector<8x32xf32>,
    %c8_90 = arith.constant 8 : index
    %c0_91 = arith.constant 0 : index
    %219 = vector.load %arg11[%c8_90, %c0_91] : memref<64x128xf32, #tpu.memory_space<vmem>>, vector<8x128xf32>
    %cst_92 = arith.constant dense<0.000000e+00> : vector<8x128xf32>
    %220 = tpu.matmul %217, %188, %cst_92 {dimension_numbers = #tpu.dot_dimension_numbers<[1], [0], [0], [1], [0, 0, 1, 1], [], []>} : vector<8x32xf32>, vector<32x128xf32>, vector<8x128xf32> -> vector<8x128xf32>
    %221 = arith.addf %219, %220 : vector<8x128xf32>
    %222 = vector.extract_strided_slice %221 {offsets = [0, 0], sizes = [8, 96], strides = [1, 1]} : vector<8x128xf32> to vector<8x96xf32>
    %cst_93 = arith.constant 5.000000e-01 : f32
    %223 = vector.broadcast %cst_93 : f32 to vector<8x96xf32>
    %224 = arith.mulf %223, %222 : vector<8x96xf32>
    %225 = math.tanh %224 : vector<8x96xf32>
    %cst_94 = arith.constant 5.000000e-01 : f32
    %226 = vector.broadcast %cst_94 : f32 to vector<8x96xf32>
    %227 = arith.mulf %226, %225 : vector<8x96xf32>
    %cst_95 = arith.constant 5.000000e-01 : f32
    %228 = vector.broadcast %cst_95 : f32 to vector<8x96xf32>
    %229 = arith.addf %227, %228 : vector<8x96xf32>
    %230 = vector.extract_strided_slice %221 {offsets = [0, 96], sizes = [8, 32], strides = [1, 1]} : vector<8x128xf32> to vector<8x32xf32>
    %231 = math.tanh %230 : vector<8x32xf32>
    %232 = vector.extract_strided_slice %229 {offsets = [0, 0], sizes = [8, 32], strides = [1, 1]} : vector<8x96xf32> to vector<8x32xf32>
    %233 = vector.extract_strided_slice %229 {offsets = [0, 32], sizes = [8, 32], strides = [1, 1]} : vector<8x96xf32> to vector<8x32xf32>
    %234 = vector.extract_strided_slice %229 {offsets = [0, 64], sizes = [8, 32], strides = [1, 1]} : vector<8x96xf32> to vector<8x32xf32>
    %235 = arith.mulf %233, %215 : vector<8x32xf32>
    %236 = arith.mulf %232, %231 : vector<8x32xf32>
    %237 = arith.addf %235, %236 : vector<8x32xf32>
    %238 = math.tanh %237 : vector<8x32xf32>
    %239 = arith.mulf %234, %238 : vector<8x32xf32>
    %c8_96 = arith.constant 8 : index
    %c0_97 = arith.constant 0 : index
    %240 = vector.load %arg12[%c8_96, %c0_97] : memref<64x32xf32, #tpu.memory_space<vmem>>, vector<8x32xf32>
    tpu.vector_store %arg12[%c8_96, %c0_97], %239 {strides = array<i32>} : memref<64x32xf32, #tpu.memory_space<vmem>>, vector<8x32xf32>,
    %c16_98 = arith.constant 16 : index
    %c0_99 = arith.constant 0 : index
    %241 = vector.load %arg11[%c16_98, %c0_99] : memref<64x128xf32, #tpu.memory_space<vmem>>, vector<8x128xf32>
    %cst_100 = arith.constant dense<0.000000e+00> : vector<8x128xf32>
    %242 = tpu.matmul %239, %188, %cst_100 {dimension_numbers = #tpu.dot_dimension_numbers<[1], [0], [0], [1], [0, 0, 1, 1], [], []>} : vector<8x32xf32>, vector<32x128xf32>, vector<8x128xf32> -> vector<8x128xf32>
    %243 = arith.addf %241, %242 : vector<8x128xf32>
    %244 = vector.extract_strided_slice %243 {offsets = [0, 0], sizes = [8, 96], strides = [1, 1]} : vector<8x128xf32> to vector<8x96xf32>
    %cst_101 = arith.constant 5.000000e-01 : f32
    %245 = vector.broadcast %cst_101 : f32 to vector<8x96xf32>
    %246 = arith.mulf %245, %244 : vector<8x96xf32>
    %247 = math.tanh %246 : vector<8x96xf32>
    %cst_102 = arith.constant 5.000000e-01 : f32
    %248 = vector.broadcast %cst_102 : f32 to vector<8x96xf32>
    %249 = arith.mulf %248, %247 : vector<8x96xf32>
    %cst_103 = arith.constant 5.000000e-01 : f32
    %250 = vector.broadcast %cst_103 : f32 to vector<8x96xf32>
    %251 = arith.addf %249, %250 : vector<8x96xf32>
    %252 = vector.extract_strided_slice %243 {offsets = [0, 96], sizes = [8, 32], strides = [1, 1]} : vector<8x128xf32> to vector<8x32xf32>
    %253 = math.tanh %252 : vector<8x32xf32>
    %254 = vector.extract_strided_slice %251 {offsets = [0, 0], sizes = [8, 32], strides = [1, 1]} : vector<8x96xf32> to vector<8x32xf32>
    %255 = vector.extract_strided_slice %251 {offsets = [0, 32], sizes = [8, 32], strides = [1, 1]} : vector<8x96xf32> to vector<8x32xf32>
    %256 = vector.extract_strided_slice %251 {offsets = [0, 64], sizes = [8, 32], strides = [1, 1]} : vector<8x96xf32> to vector<8x32xf32>
    %257 = arith.mulf %255, %237 : vector<8x32xf32>
    %258 = arith.mulf %254, %253 : vector<8x32xf32>
    %259 = arith.addf %257, %258 : vector<8x32xf32>
    %260 = math.tanh %259 : vector<8x32xf32>
    %261 = arith.mulf %256, %260 : vector<8x32xf32>
    %c16_104 = arith.constant 16 : index
    %c0_105 = arith.constant 0 : index
    %262 = vector.load %arg12[%c16_104, %c0_105] : memref<64x32xf32, #tpu.memory_space<vmem>>, vector<8x32xf32>
    tpu.vector_store %arg12[%c16_104, %c0_105], %261 {strides = array<i32>} : memref<64x32xf32, #tpu.memory_space<vmem>>, vector<8x32xf32>,
    %c24_106 = arith.constant 24 : index
    %c0_107 = arith.constant 0 : index
    %263 = vector.load %arg11[%c24_106, %c0_107] : memref<64x128xf32, #tpu.memory_space<vmem>>, vector<8x128xf32>
    %cst_108 = arith.constant dense<0.000000e+00> : vector<8x128xf32>
    %264 = tpu.matmul %261, %188, %cst_108 {dimension_numbers = #tpu.dot_dimension_numbers<[1], [0], [0], [1], [0, 0, 1, 1], [], []>} : vector<8x32xf32>, vector<32x128xf32>, vector<8x128xf32> -> vector<8x128xf32>
    %265 = arith.addf %263, %264 : vector<8x128xf32>
    %266 = vector.extract_strided_slice %265 {offsets = [0, 0], sizes = [8, 96], strides = [1, 1]} : vector<8x128xf32> to vector<8x96xf32>
    %cst_109 = arith.constant 5.000000e-01 : f32
    %267 = vector.broadcast %cst_109 : f32 to vector<8x96xf32>
    %268 = arith.mulf %267, %266 : vector<8x96xf32>
    %269 = math.tanh %268 : vector<8x96xf32>
    %cst_110 = arith.constant 5.000000e-01 : f32
    %270 = vector.broadcast %cst_110 : f32 to vector<8x96xf32>
    %271 = arith.mulf %270, %269 : vector<8x96xf32>
    %cst_111 = arith.constant 5.000000e-01 : f32
    %272 = vector.broadcast %cst_111 : f32 to vector<8x96xf32>
    %273 = arith.addf %271, %272 : vector<8x96xf32>
    %274 = vector.extract_strided_slice %265 {offsets = [0, 96], sizes = [8, 32], strides = [1, 1]} : vector<8x128xf32> to vector<8x32xf32>
    %275 = math.tanh %274 : vector<8x32xf32>
    %276 = vector.extract_strided_slice %273 {offsets = [0, 0], sizes = [8, 32], strides = [1, 1]} : vector<8x96xf32> to vector<8x32xf32>
    %277 = vector.extract_strided_slice %273 {offsets = [0, 32], sizes = [8, 32], strides = [1, 1]} : vector<8x96xf32> to vector<8x32xf32>
    %278 = vector.extract_strided_slice %273 {offsets = [0, 64], sizes = [8, 32], strides = [1, 1]} : vector<8x96xf32> to vector<8x32xf32>
    %279 = arith.mulf %277, %259 : vector<8x32xf32>
    %280 = arith.mulf %276, %275 : vector<8x32xf32>
    %281 = arith.addf %279, %280 : vector<8x32xf32>
    %282 = math.tanh %281 : vector<8x32xf32>
    %283 = arith.mulf %278, %282 : vector<8x32xf32>
    %c24_112 = arith.constant 24 : index
    %c0_113 = arith.constant 0 : index
    %284 = vector.load %arg12[%c24_112, %c0_113] : memref<64x32xf32, #tpu.memory_space<vmem>>, vector<8x32xf32>
    tpu.vector_store %arg12[%c24_112, %c0_113], %283 {strides = array<i32>} : memref<64x32xf32, #tpu.memory_space<vmem>>, vector<8x32xf32>,
    %c32_114 = arith.constant 32 : index
    %c0_115 = arith.constant 0 : index
    %285 = vector.load %arg11[%c32_114, %c0_115] : memref<64x128xf32, #tpu.memory_space<vmem>>, vector<8x128xf32>
    %cst_116 = arith.constant dense<0.000000e+00> : vector<8x128xf32>
    %286 = tpu.matmul %283, %188, %cst_116 {dimension_numbers = #tpu.dot_dimension_numbers<[1], [0], [0], [1], [0, 0, 1, 1], [], []>} : vector<8x32xf32>, vector<32x128xf32>, vector<8x128xf32> -> vector<8x128xf32>
    %287 = arith.addf %285, %286 : vector<8x128xf32>
    %288 = vector.extract_strided_slice %287 {offsets = [0, 0], sizes = [8, 96], strides = [1, 1]} : vector<8x128xf32> to vector<8x96xf32>
    %cst_117 = arith.constant 5.000000e-01 : f32
    %289 = vector.broadcast %cst_117 : f32 to vector<8x96xf32>
    %290 = arith.mulf %289, %288 : vector<8x96xf32>
    %291 = math.tanh %290 : vector<8x96xf32>
    %cst_118 = arith.constant 5.000000e-01 : f32
    %292 = vector.broadcast %cst_118 : f32 to vector<8x96xf32>
    %293 = arith.mulf %292, %291 : vector<8x96xf32>
    %cst_119 = arith.constant 5.000000e-01 : f32
    %294 = vector.broadcast %cst_119 : f32 to vector<8x96xf32>
    %295 = arith.addf %293, %294 : vector<8x96xf32>
    %296 = vector.extract_strided_slice %287 {offsets = [0, 96], sizes = [8, 32], strides = [1, 1]} : vector<8x128xf32> to vector<8x32xf32>
    %297 = math.tanh %296 : vector<8x32xf32>
    %298 = vector.extract_strided_slice %295 {offsets = [0, 0], sizes = [8, 32], strides = [1, 1]} : vector<8x96xf32> to vector<8x32xf32>
    %299 = vector.extract_strided_slice %295 {offsets = [0, 32], sizes = [8, 32], strides = [1, 1]} : vector<8x96xf32> to vector<8x32xf32>
    %300 = vector.extract_strided_slice %295 {offsets = [0, 64], sizes = [8, 32], strides = [1, 1]} : vector<8x96xf32> to vector<8x32xf32>
    %301 = arith.mulf %299, %281 : vector<8x32xf32>
    %302 = arith.mulf %298, %297 : vector<8x32xf32>
    %303 = arith.addf %301, %302 : vector<8x32xf32>
    %304 = math.tanh %303 : vector<8x32xf32>
    %305 = arith.mulf %300, %304 : vector<8x32xf32>
    %c32_120 = arith.constant 32 : index
    %c0_121 = arith.constant 0 : index
    %306 = vector.load %arg12[%c32_120, %c0_121] : memref<64x32xf32, #tpu.memory_space<vmem>>, vector<8x32xf32>
    tpu.vector_store %arg12[%c32_120, %c0_121], %305 {strides = array<i32>} : memref<64x32xf32, #tpu.memory_space<vmem>>, vector<8x32xf32>,
    %c40_122 = arith.constant 40 : index
    %c0_123 = arith.constant 0 : index
    %307 = vector.load %arg11[%c40_122, %c0_123] : memref<64x128xf32, #tpu.memory_space<vmem>>, vector<8x128xf32>
    %cst_124 = arith.constant dense<0.000000e+00> : vector<8x128xf32>
    %308 = tpu.matmul %305, %188, %cst_124 {dimension_numbers = #tpu.dot_dimension_numbers<[1], [0], [0], [1], [0, 0, 1, 1], [], []>} : vector<8x32xf32>, vector<32x128xf32>, vector<8x128xf32> -> vector<8x128xf32>
    %309 = arith.addf %307, %308 : vector<8x128xf32>
    %310 = vector.extract_strided_slice %309 {offsets = [0, 0], sizes = [8, 96], strides = [1, 1]} : vector<8x128xf32> to vector<8x96xf32>
    %cst_125 = arith.constant 5.000000e-01 : f32
    %311 = vector.broadcast %cst_125 : f32 to vector<8x96xf32>
    %312 = arith.mulf %311, %310 : vector<8x96xf32>
    %313 = math.tanh %312 : vector<8x96xf32>
    %cst_126 = arith.constant 5.000000e-01 : f32
    %314 = vector.broadcast %cst_126 : f32 to vector<8x96xf32>
    %315 = arith.mulf %314, %313 : vector<8x96xf32>
    %cst_127 = arith.constant 5.000000e-01 : f32
    %316 = vector.broadcast %cst_127 : f32 to vector<8x96xf32>
    %317 = arith.addf %315, %316 : vector<8x96xf32>
    %318 = vector.extract_strided_slice %309 {offsets = [0, 96], sizes = [8, 32], strides = [1, 1]} : vector<8x128xf32> to vector<8x32xf32>
    %319 = math.tanh %318 : vector<8x32xf32>
    %320 = vector.extract_strided_slice %317 {offsets = [0, 0], sizes = [8, 32], strides = [1, 1]} : vector<8x96xf32> to vector<8x32xf32>
    %321 = vector.extract_strided_slice %317 {offsets = [0, 32], sizes = [8, 32], strides = [1, 1]} : vector<8x96xf32> to vector<8x32xf32>
    %322 = vector.extract_strided_slice %317 {offsets = [0, 64], sizes = [8, 32], strides = [1, 1]} : vector<8x96xf32> to vector<8x32xf32>
    %323 = arith.mulf %321, %303 : vector<8x32xf32>
    %324 = arith.mulf %320, %319 : vector<8x32xf32>
    %325 = arith.addf %323, %324 : vector<8x32xf32>
    %326 = math.tanh %325 : vector<8x32xf32>
    %327 = arith.mulf %322, %326 : vector<8x32xf32>
    %c40_128 = arith.constant 40 : index
    %c0_129 = arith.constant 0 : index
    %328 = vector.load %arg12[%c40_128, %c0_129] : memref<64x32xf32, #tpu.memory_space<vmem>>, vector<8x32xf32>
    tpu.vector_store %arg12[%c40_128, %c0_129], %327 {strides = array<i32>} : memref<64x32xf32, #tpu.memory_space<vmem>>, vector<8x32xf32>,
    %c48_130 = arith.constant 48 : index
    %c0_131 = arith.constant 0 : index
    %329 = vector.load %arg11[%c48_130, %c0_131] : memref<64x128xf32, #tpu.memory_space<vmem>>, vector<8x128xf32>
    %cst_132 = arith.constant dense<0.000000e+00> : vector<8x128xf32>
    %330 = tpu.matmul %327, %188, %cst_132 {dimension_numbers = #tpu.dot_dimension_numbers<[1], [0], [0], [1], [0, 0, 1, 1], [], []>} : vector<8x32xf32>, vector<32x128xf32>, vector<8x128xf32> -> vector<8x128xf32>
    %331 = arith.addf %329, %330 : vector<8x128xf32>
    %332 = vector.extract_strided_slice %331 {offsets = [0, 0], sizes = [8, 96], strides = [1, 1]} : vector<8x128xf32> to vector<8x96xf32>
    %cst_133 = arith.constant 5.000000e-01 : f32
    %333 = vector.broadcast %cst_133 : f32 to vector<8x96xf32>
    %334 = arith.mulf %333, %332 : vector<8x96xf32>
    %335 = math.tanh %334 : vector<8x96xf32>
    %cst_134 = arith.constant 5.000000e-01 : f32
    %336 = vector.broadcast %cst_134 : f32 to vector<8x96xf32>
    %337 = arith.mulf %336, %335 : vector<8x96xf32>
    %cst_135 = arith.constant 5.000000e-01 : f32
    %338 = vector.broadcast %cst_135 : f32 to vector<8x96xf32>
    %339 = arith.addf %337, %338 : vector<8x96xf32>
    %340 = vector.extract_strided_slice %331 {offsets = [0, 96], sizes = [8, 32], strides = [1, 1]} : vector<8x128xf32> to vector<8x32xf32>
    %341 = math.tanh %340 : vector<8x32xf32>
    %342 = vector.extract_strided_slice %339 {offsets = [0, 0], sizes = [8, 32], strides = [1, 1]} : vector<8x96xf32> to vector<8x32xf32>
    %343 = vector.extract_strided_slice %339 {offsets = [0, 32], sizes = [8, 32], strides = [1, 1]} : vector<8x96xf32> to vector<8x32xf32>
    %344 = vector.extract_strided_slice %339 {offsets = [0, 64], sizes = [8, 32], strides = [1, 1]} : vector<8x96xf32> to vector<8x32xf32>
    %345 = arith.mulf %343, %325 : vector<8x32xf32>
    %346 = arith.mulf %342, %341 : vector<8x32xf32>
    %347 = arith.addf %345, %346 : vector<8x32xf32>
    %348 = math.tanh %347 : vector<8x32xf32>
    %349 = arith.mulf %344, %348 : vector<8x32xf32>
    %c48_136 = arith.constant 48 : index
    %c0_137 = arith.constant 0 : index
    %350 = vector.load %arg12[%c48_136, %c0_137] : memref<64x32xf32, #tpu.memory_space<vmem>>, vector<8x32xf32>
    tpu.vector_store %arg12[%c48_136, %c0_137], %349 {strides = array<i32>} : memref<64x32xf32, #tpu.memory_space<vmem>>, vector<8x32xf32>,
    %c56_138 = arith.constant 56 : index
    %c0_139 = arith.constant 0 : index
    %351 = vector.load %arg11[%c56_138, %c0_139] : memref<64x128xf32, #tpu.memory_space<vmem>>, vector<8x128xf32>
    %cst_140 = arith.constant dense<0.000000e+00> : vector<8x128xf32>
    %352 = tpu.matmul %349, %188, %cst_140 {dimension_numbers = #tpu.dot_dimension_numbers<[1], [0], [0], [1], [0, 0, 1, 1], [], []>} : vector<8x32xf32>, vector<32x128xf32>, vector<8x128xf32> -> vector<8x128xf32>
    %353 = arith.addf %351, %352 : vector<8x128xf32>
    %354 = vector.extract_strided_slice %353 {offsets = [0, 0], sizes = [8, 96], strides = [1, 1]} : vector<8x128xf32> to vector<8x96xf32>
    %cst_141 = arith.constant 5.000000e-01 : f32
    %355 = vector.broadcast %cst_141 : f32 to vector<8x96xf32>
    %356 = arith.mulf %355, %354 : vector<8x96xf32>
    %357 = math.tanh %356 : vector<8x96xf32>
    %cst_142 = arith.constant 5.000000e-01 : f32
    %358 = vector.broadcast %cst_142 : f32 to vector<8x96xf32>
    %359 = arith.mulf %358, %357 : vector<8x96xf32>
    %cst_143 = arith.constant 5.000000e-01 : f32
    %360 = vector.broadcast %cst_143 : f32 to vector<8x96xf32>
    %361 = arith.addf %359, %360 : vector<8x96xf32>
    %362 = vector.extract_strided_slice %353 {offsets = [0, 96], sizes = [8, 32], strides = [1, 1]} : vector<8x128xf32> to vector<8x32xf32>
    %363 = math.tanh %362 : vector<8x32xf32>
    %364 = vector.extract_strided_slice %361 {offsets = [0, 0], sizes = [8, 32], strides = [1, 1]} : vector<8x96xf32> to vector<8x32xf32>
    %365 = vector.extract_strided_slice %361 {offsets = [0, 32], sizes = [8, 32], strides = [1, 1]} : vector<8x96xf32> to vector<8x32xf32>
    %366 = vector.extract_strided_slice %361 {offsets = [0, 64], sizes = [8, 32], strides = [1, 1]} : vector<8x96xf32> to vector<8x32xf32>
    %367 = arith.mulf %365, %347 : vector<8x32xf32>
    %368 = arith.mulf %364, %363 : vector<8x32xf32>
    %369 = arith.addf %367, %368 : vector<8x32xf32>
    %370 = math.tanh %369 : vector<8x32xf32>
    %371 = arith.mulf %366, %370 : vector<8x32xf32>
    %c56_144 = arith.constant 56 : index
    %c0_145 = arith.constant 0 : index
    %372 = vector.load %arg12[%c56_144, %c0_145] : memref<64x32xf32, #tpu.memory_space<vmem>>, vector<8x32xf32>
    tpu.vector_store %arg12[%c56_144, %c0_145], %371 {strides = array<i32>} : memref<64x32xf32, #tpu.memory_space<vmem>>, vector<8x32xf32>,
    %c0_146 = arith.constant 0 : index
    %c0_147 = arith.constant 0 : index
    %373 = vector.load %arg8[%c0_146, %c0_147] : memref<32x4xf32, #tpu.memory_space<vmem>>, vector<32x4xf32>
    %c0_148 = arith.constant 0 : index
    %c0_149 = arith.constant 0 : index
    %374 = vector.load %arg9[%c0_148, %c0_149] : memref<1x4xf32, #tpu.memory_space<vmem>>, vector<1x4xf32>
    %cst_150 = arith.constant dense<0.000000e+00> : vector<8x4xf32>
    %375 = tpu.matmul %371, %373, %cst_150 {dimension_numbers = #tpu.dot_dimension_numbers<[1], [0], [0], [1], [0, 0, 1, 1], [], []>} : vector<8x32xf32>, vector<32x4xf32>, vector<8x4xf32> -> vector<8x4xf32>
    %376 = vector.broadcast %374 : vector<1x4xf32> to vector<8x4xf32>
    %377 = arith.addf %375, %376 : vector<8x4xf32>
    %c0_151 = arith.constant 0 : index
    %c0_152 = arith.constant 0 : index
    %378 = vector.load %arg10[%c0_151, %c0_152] : memref<8x4xf32, #tpu.memory_space<vmem>>, vector<8x4xf32>
    tpu.vector_store %arg10[%c0_151, %c0_152], %377 {strides = array<i32>} : memref<8x4xf32, #tpu.memory_space<vmem>>, vector<8x4xf32>,
    return
  }
  func.func @transform_0(%arg0: i32) -> (i32, i32, i32) {
    %c0_i32 = arith.constant 0 : i32
    %c0_i32_0 = arith.constant 0 : i32
    %c0_i32_1 = arith.constant 0 : i32
    return %c0_i32, %arg0, %c0_i32_0 : i32, i32, i32
  }
  func.func @transform_1(%arg0: i32) -> (i32, i32) {
    %c0_i32 = arith.constant 0 : i32
    %c0_i32_0 = arith.constant 0 : i32
    %c0_i32_1 = arith.constant 0 : i32
    return %c0_i32, %c0_i32_0 : i32, i32
  }
  func.func @transform_2(%arg0: i32) -> (i32, i32) {
    %c0_i32 = arith.constant 0 : i32
    %c0_i32_0 = arith.constant 0 : i32
    %c0_i32_1 = arith.constant 0 : i32
    return %c0_i32, %c0_i32_0 : i32, i32
  }
  func.func @transform_3(%arg0: i32) -> (i32, i32) {
    %c0_i32 = arith.constant 0 : i32
    %c0_i32_0 = arith.constant 0 : i32
    %c0_i32_1 = arith.constant 0 : i32
    return %c0_i32, %c0_i32_0 : i32, i32
  }
  func.func @transform_4(%arg0: i32) -> (i32, i32) {
    %c0_i32 = arith.constant 0 : i32
    %c0_i32_0 = arith.constant 0 : i32
    %c0_i32_1 = arith.constant 0 : i32
    return %c0_i32, %c0_i32_0 : i32, i32
  }
  func.func @transform_5(%arg0: i32) -> (i32, i32) {
    %c0_i32 = arith.constant 0 : i32
    %c0_i32_0 = arith.constant 0 : i32
    %c0_i32_1 = arith.constant 0 : i32
    return %c0_i32, %c0_i32_0 : i32, i32
  }
  func.func @transform_6(%arg0: i32) -> (i32, i32) {
    %c0_i32 = arith.constant 0 : i32
    %c0_i32_0 = arith.constant 0 : i32
    %c0_i32_1 = arith.constant 0 : i32
    return %c0_i32, %c0_i32_0 : i32, i32
  }
  func.func @transform_7(%arg0: i32) -> (i32, i32) {
    %c0_i32 = arith.constant 0 : i32
    %c0_i32_0 = arith.constant 0 : i32
    %c0_i32_1 = arith.constant 0 : i32
    return %c0_i32, %c0_i32_0 : i32, i32
  }
  func.func @transform_8(%arg0: i32) -> (i32, i32) {
    %c0_i32 = arith.constant 0 : i32
    %c0_i32_0 = arith.constant 0 : i32
    %c0_i32_1 = arith.constant 0 : i32
    return %c0_i32, %c0_i32_0 : i32, i32
  }
  func.func @transform_9(%arg0: i32) -> (i32, i32) {
    %c0_i32 = arith.constant 0 : i32
    %c0_i32_0 = arith.constant 0 : i32
    return %arg0, %c0_i32 : i32, i32
  }
}

</mosaic_0001>

<bundles_post_ra>
// kernel: tpu_custom_call.1
= control target key start
LH: loop header
LB: loop body
LE: loop exit
PB: predicated region body
PF: predicated region fallthrough
CT: control target
= control target key end

     0   :  { %s3918_s0 = inlined_call_operand.hbm [shape: f32[8,16,16], index: 0, kind: input, shape index: {}]   ;;  %s3919_s1 = inlined_call_operand.hbm [shape: f32[16,128], index: 1, kind: input, shape index: {}]   ;;  %s3920_s2 = inlined_call_operand.vmem [shape: f32[32,128], index: 2, kind: input, shape index: {}]   ;;  %s3921_s3 = inlined_call_operand.vmem [shape: f32[1,128], index: 3, kind: input, shape index: {}]   ;;  %s3922_s4 = inlined_call_operand.hbm [shape: f32[32,128], index: 4, kind: input, shape index: {}]   ;;  %s3923_s5 = inlined_call_operand.hbm [shape: f32[32,128], index: 5, kind: input, shape index: {}]   ;;  %s3924_s6 = inlined_call_operand.vmem [shape: f32[1,128], index: 6, kind: input, shape index: {}]   ;;  %s3925_s7 = inlined_call_operand.vmem [shape: f32[32,4], index: 7, kind: input, shape index: {}]   ;;  %s3926_s8 = inlined_call_operand.vmem [shape: f32[1,4], index: 8, kind: input, shape index: {}]   ;;  %s3927_s9 = inlined_call_operand.vmem [shape: f32[16,4], index: 9, kind: output, shape index: {}]  }
   0x1   :  { %3935 = sst [smem:[#allocation16_spill]] %s3924_s6 }
   0x2   :  { %3936 = sst [smem:[#allocation17_spill]] %s3925_s7 }
   0x3   :  { %3937 = sst [smem:[#allocation18_spill]] %s3926_s8 }
   0x4   :  { %3938 = sst [smem:[#allocation19_spill]] %s3927_s9 }
   0x5   :  { %14 = vsyncpa [#allocation5], 0 }
   0x6   :  { %16 = vsyncpa [#allocation5 + $0x1], 0 }
   0x7   :  { %17 = vsyncpa [#allocation7], 0 }
   0x8   :  { %18 = vsyncpa [#allocation10], 0  ;;  %s3396_s30 = smov 0   ;;  %s3398_s10 = smov 0  }
   0x9   :  { %s3400_s11 = smov 0   ;;  %s3402_s12 = smov 0  }
   0xa LB: > { %s3415_s13 = sadd.s32 4294967295, %s3332_s12   ;;  %s3418_s14 = sadd.s32 1, %s3332_s12   ;;  %s3332_s12 = sphi %s3402_s12, %s3957_s12   ;;  %s3328_s11 = sphi %s3400_s11, %s3961_s11   ;;  %s3324_s10 = sphi %s3398_s10, %s3960_s10   ;;  %s3320_s30 = sphi %s3396_s30, %s3959_s30  }
   0xb   : > { %3939 = sst [smem:[#allocation14_spill]] %s3418_s14  ;;  %s28_s15 = ssub.s32 %s3332_s12, %s3418_s14 }
   0xc   : > { %s31_s16 = sadd.s32 1, %s3328_s11  ;;  %p29_p0 = scmp.eq.s32.totalorder %s28_s15, 0 }
   0xd   : > { %p38_p1 = scmp.ne.s32.totalorder %s3328_s11, %s3324_s10  ;;  %p39_p2 = scmp.eq.s32.totalorder %s3332_s12, 0 }
   0xe   : > { %p44_p3 = scmp.ne.s32.totalorder %s3324_s10, %s3320_s30  ;;  %p3928_p5 = scmp.eq.s32.totalorder %s3415_s13, 0 }
   0xf   : > { %s3428_s17 = scalar_select %p29_p0, %s3328_s11, %s31_s16  }
  0x10   : > { %p40_p4 = por %p39_p2, %p38_p1  ;;  %p2509_p6 = scmp.ge.s32.totalorder %s3332_s12, 1 }
  0x11   : > { %3940 = sst [smem:[#allocation15_spill]] %s3428_s17  ;;  %p249_p7 = scmp.lt.s32.totalorder %s3332_s12, 3 }
  0x12   : > { %p3435_p8 = por %p3928_p5, %p44_p3  ;;  %s3334_s20 = smov [#allocation6]  }
  0x13   : > { %p3439_p9 = pnand %p2509_p6, %p249_p7  ;;  %s261_s21 = sshll.u32 %s3334_s20, 4  ;;  %s262_s21 = int_to_ptr.vmem [resolvable:$true] %s261_s21 }
  0x14   : > { %s3941_s18 = scalar_select %p3435_p8, 1, 0 }
  0x15   : > { %s3942_s19 = scalar_select %p3439_p9, 1, 0 }
  0x16   : > { %p3016_p10 = pneg %p3439_p9  ;;  %p3033_p12 = scmp.lt.s32.totalorder %s3332_s12, 2 }
  0x17   : > { %s3176_s26 = scalar_lea.hbm %s3919_s1, 256 }
  0x18   : > { %p3447_p11 = pnand %p3016_p10, %p3928_p5  ;;  %p3452_p13 = pnand %p3033_p12, %p40_p4 }
  0x19   : > { %p3177_p0 = scmp.ne.s32.totalorder %s3919_s1, %s3176_s26  ;;  %p3183_p4 = scmp.lt.u32.totalorder %s3176_s26, %s3919_s1 }
  0x1a   : > { %s3944_s23 = scalar_select %p3452_p13, 1, 0 }
  0x1b   : > { %p3464_p1 = pneg %p3447_p11 }
  0x1d   : > { %p3179_p2 = pnand %p3464_p1, %p3177_p0 }
  0x1f   : > { %p3180_p3 = pneg %p3179_p2 }
  0x21   : > { %p3185_p6 = pnand %p3183_p4, %p3180_p3 }
  0x23   : > { %3188 = shalt.err (!%p3185_p6)
}
  0x24   : > { %s3189_s16 = scalar_lea.vmem %s262_s21, 256  ;;  %p3197_p5 = scmp.lt.s32.totalorder %s262_s21, %s262_s21 }
  0x25   : > { %p3190_p7 = scmp.ne.s32.totalorder %s262_s21, %s3189_s16  ;;  %p3198_p8 = scmp.lt.s32.totalorder %s3189_s16, %s3189_s16 }
  0x27   : > { %p3192_p10 = pnand %p3190_p7, %p3464_p1  ;;  %p3199_p9 = por %p3198_p8, %p3197_p5 }
  0x29   : > { %p3193_p12 = pneg %p3192_p10 }
  0x2b   : > { %p3200_p13 = pnand %p3199_p9, %p3193_p12 }
  0x2d   : > { %3203 = shalt.err (!%p3200_p13)
}
  0x2e   : > { %s3335_s20 = smov 128   ;;  %s3336_s24 = smov 8  }
  0x2f   : > { %3019 = dma.hbm_to_vmem [thread:$0]  (!%p3447_p11), %s3919_s1, 256, %s262_s21, [#allocation7], %s3335_s20, %s3335_s20, %s3336_s24  }
  0x30   : > { %s3337_s27 = smov [#allocation8]   ;;  %s3338_s30 = smov [#allocation9]  }
  0x31   : > { %s280_s28 = sshll.u32 %s3337_s27, 4  ;;  %s293_s15 = sshll.u32 %s3338_s30, 4  ;;  %s281_s28 = int_to_ptr.vmem [resolvable:$true] %s280_s28  ;;  %s294_s15 = int_to_ptr.vmem [resolvable:$true] %s293_s15 }
  0x32   : > { %s3204_s14 = scalar_lea.hbm %s3922_s4, 512 }
  0x33   : > { %p3205_p5 = scmp.ne.s32.totalorder %s3922_s4, %s3204_s14  ;;  %p3211_p13 = scmp.lt.u32.totalorder %s3204_s14, %s3922_s4 }
  0x35   : > { %p3207_p8 = pnand %p3205_p5, %p3464_p1 }
  0x37   : > { %p3208_p9 = pneg %p3207_p8 }
  0x39   : > { %p3213_p0 = pnand %p3211_p13, %p3208_p9 }
  0x3b   : > { %3216 = shalt.err (!%p3213_p0)
}
  0x3c   : > { %s3217_s21 = scalar_lea.vmem %s281_s28, 512  ;;  %p3225_p6 = scmp.lt.s32.totalorder %s281_s28, %s281_s28 }
  0x3d   : > { %p3218_p2 = scmp.ne.s32.totalorder %s281_s28, %s3217_s21  ;;  %p3226_p7 = scmp.lt.s32.totalorder %s3217_s21, %s3217_s21 }
  0x3f   : > { %p3220_p3 = pnand %p3218_p2, %p3464_p1  ;;  %p3227_p10 = por %p3226_p7, %p3225_p6 }
  0x41   : > { %p3221_p4 = pneg %p3220_p3 }
  0x43   : > { %p3228_p12 = pnand %p3227_p10, %p3221_p4 }
  0x45   : > { %3231 = shalt.err (!%p3228_p12)
}
  0x46   : > { %3022 = dma.hbm_to_vmem [thread:$0]  (!%p3447_p11), %s3922_s4, 512, %s281_s28, [#allocation7], %s3335_s20, %s3335_s20, %s3336_s24  }
  0x47   : > { %s316_s8 = sand.u32 1, %s3328_s11   ;;  %s3232_s17 = scalar_lea.hbm %s3923_s5, 512 }
  0x48   : > { %p3233_p5 = scmp.ne.s32.totalorder %s3923_s5, %s3232_s17  ;;  %p3239_p13 = scmp.lt.u32.totalorder %s3232_s17, %s3923_s5 }
  0x4a   : > { %p3235_p8 = pnand %p3233_p5, %p3464_p1 }
  0x4c   : > { %p3236_p9 = pneg %p3235_p8 }
  0x4e   : > { %p3241_p0 = pnand %p3239_p13, %p3236_p9 }
  0x50   : > { %3244 = shalt.err (!%p3241_p0)
}
  0x51   : > { %s3245_s28 = scalar_lea.vmem %s294_s15, 512  ;;  %p3253_p6 = scmp.lt.s32.totalorder %s294_s15, %s294_s15 }
  0x52   : > { %p3246_p2 = scmp.ne.s32.totalorder %s294_s15, %s3245_s28  ;;  %p3254_p7 = scmp.lt.s32.totalorder %s3245_s28, %s3245_s28 }
  0x54   : > { %p3248_p3 = pnand %p3246_p2, %p3464_p1  ;;  %p3255_p10 = por %p3254_p7, %p3253_p6 }
  0x56   : > { %p3249_p4 = pneg %p3248_p3 }
  0x58   : > { %p3256_p12 = pnand %p3255_p10, %p3249_p4 }
  0x5a   : > { %3259 = shalt.err (!%p3256_p12)
}
  0x5b   : > { %3025 = dma.hbm_to_vmem [thread:$0]  (!%p3447_p11), %s3923_s5, 512, %s294_s15, [#allocation10], %s3335_s20, %s3335_s20, %s3336_s24  }
  0x5c   : > { %s2514_s29 = sshll.u32 %s316_s8, 6  ;;  %s2515_s6 = sshll.u32 %s3332_s12, 7 }
  0x5d   : > { %s3530_s14 = scalar_lea.hbm %s3918_s0, %s2515_s6  ;;  %s320_s22 = scalar_lea.vmem [#allocation4], %s2514_s29 }
  0x5e   : > { %s326_s17 = sshll.u32 %s320_s22, 4  ;;  %s3534_s25 = scalar_lea.sflag [#allocation5], %s316_s8  ;;  %s3532_s17 = int_to_ptr.vmem [resolvable:$true] %s326_s17 }
  0x5f   : > { %s3260_s26 = scalar_lea.hbm %s3530_s14, 1024  ;;  %p3946_p11 = scmp.ne.s32.totalorder %s3944_s23, 0 }
  0x60   : > { %p3261_p1 = scmp.ne.s32.totalorder %s3530_s14, %s3260_s26  ;;  %s3265_s27 = scalar_lea.hbm %s3918_s0, 2048 }
  0x61   : > { %p3262_p5 = pneg %p3946_p11  ;;  %p3266_p13 = scmp.lt.u32.totalorder %s3530_s14, %s3918_s0 }
  0x62   : > { %p3267_p0 = scmp.lt.u32.totalorder %s3265_s27, %s3260_s26  ;;  %p3269_p3 = scmp.lt.u32.totalorder %s3260_s26, %s3530_s14 }
  0x63   : > { %p3263_p8 = pnand %p3262_p5, %p3261_p1 }
  0x64   : > { %p3268_p2 = por %p3267_p0, %p3266_p13 }
  0x65   : > { %p3264_p9 = pneg %p3263_p8 }
  0x66   : > { %p3270_p4 = por %p3269_p3, %p3268_p2 }
  0x68   : > { %p3271_p6 = pnand %p3270_p4, %p3264_p9 }
  0x6a   : > { %3274 = shalt.err (!%p3271_p6)
}
  0x6b   : > { %s3275_s8 = scalar_lea.vmem %s3532_s17, 1024  ;;  %s3339_s16 = smov [#allocation4]  }
  0x6c   : > { %p3276_p7 = scmp.ne.s32.totalorder %s3532_s17, %s3275_s8  ;;  %s3280_s21 = sshll.u32 %s3339_s16, 4  ;;  %s3281_s21 = int_to_ptr.vmem [resolvable:$false] %s3280_s21 }
  0x6d   : > { %s3282_s29 = scalar_lea.vmem %s3281_s21, 2048  ;;  %p3283_p1 = scmp.lt.s32.totalorder %s3532_s17, %s3281_s21 }
  0x6e   : > { %p3278_p10 = pnand %p3276_p7, %p3262_p5  ;;  %p3284_p8 = scmp.lt.s32.totalorder %s3282_s29, %s3275_s8 }
  0x70   : > { %p3279_p12 = pneg %p3278_p10  ;;  %p3285_p13 = por %p3284_p8, %p3283_p1 }
  0x72   : > { %p3286_p0 = pnand %p3285_p13, %p3279_p12 }
  0x74   : > { %3289 = shalt.err (!%p3286_p0)
}
  0x75   : > { %s3340_s6 = smov 256   ;;  %p3947_p5 = scmp.ne.s32.totalorder %s3942_s19, 0 }
  0x76   : > { %3029 = dma.hbm_to_vmem [thread:$0]  (!%p3946_p11), %s3530_s14, 1024, %s3532_s17, %s3534_s25, %s3340_s6, %s3335_s20, %s3336_s24  }
  0x77   : > { %338 = sbr.rel (%p3947_p5) target bundleno = 10897 (0x2a91), region = 56  ;;  %s340_s7 = sand.u32 (!%p3947_p5), 1, %s3324_s10  }
  0x78   : > { %s2517_s9 = sshll.u32 (!%p3947_p5), %s340_s7, 6  ;;  %s341_s22 = scalar_lea.sflag (!%p3947_p5), [#allocation5], %s340_s7 }
  0x79   : > { %s3567_s26 = scalar_lea.vmem (!%p3947_p5), [#allocation4], %s2517_s9  ;;  %p3948_p9 = scmp.ne.s32.totalorder (!%p3947_p5), %s3941_s18, 0 }
  0x7e   : > { %3307 = dma.done.wait (%p3948_p9), %s341_s22, 1024  }
  0x7f   : > { %3309 = vsyncadd (%p3948_p9), %s341_s22, 4294966272  ;;  %p3949_p2 = scmp.eq.s32.totalorder %s3415_s13, 0 }
  0x81   : > { %3311 = dma.done.wait (%p3949_p2), [#allocation7], 768   ;;  %p3950_p11 = pmov %p3949_p2 }
  0x82   : > { %p3951_p3 = pmov %p3949_p2 }
  0x83   : > { %3313 = vsyncadd (%p3950_p11), [#allocation7], 4294966528 }
  0x84   : > { %3315 = dma.done.wait (%p3951_p3), [#allocation10], 512   ;;  %p3952_p4 = pmov %p3949_p2 }
  0x85   : > { %v3341_v0 = vmov 0.0|0.0   ;;  %vm3342_vm0 = vmmov 0   ;;  %v3343_v1 = vmov 0.0   ;;  %vm415_vm1 = vcmask 130048   ;;  %v394_v2 = vld [vmem:[#allocation6] sm:$0xff]  ;;  %v395_v3 = vld [vmem:[#allocation6 + $0x8] sm:$0xff] }
  0x86   : > { %3317 = vsyncadd (%p3952_p4), [#allocation10], 4294966784  ;;  %2892 = vmatprep.subr.bf16.mxu1 %v3341_v0  ;;  %2689 = vmatprep.mubr.msk.f32.mxu1 %vm3342_vm0, %v3343_v1  ;;  %v396_v4 = vld [vmem:[%s3920_s2] sm:$0xff]  ;;  %v2888_v5 = vpack.c.bf16 %v395_v3, %v394_v2  ;;  %v397_v6 = vld [vmem:[%s3920_s2 + $0x8] sm:$0xff]  ;;  %s3344_s27 = smov 32   ;;  %s3345_s30 = smov 64  }
  0x87   : > { %v401_v7 = vld [vmem:[%s3567_s26] sm:$0xff]  ;;  %v3591_v8 = vpack.c.bf16 %v397_v6, %v396_v4  ;;  %v398_v9 = vld [vmem:[%s3920_s2 + $0x10] sm:$0xff]  ;;  %v399_v10 = vld [vmem:[%s3920_s2 + $0x18] sm:$0xff]  ;;  %vm554_vm2 = vcmask 261120   ;;  %s3953_s16 = sld [smem:[#allocation16_spill]]  ;;  %s3954_s6 = sld [smem:[#allocation17_spill]] }
  0x88   : > { %2669 = vmatprep.mubr.msk.f32.mxu0 %vm415_vm1, %v401_v7  ;;  %2889 = vmatprep.subr.bf16.mxu0 %v2888_v5  ;;  %v402_v11 = vld [vmem:[%s3567_s26 + $0x8] sm:$0xff]  ;;  %v3602_v12 = vpack.c.bf16 %v399_v10, %v398_v9  ;;  %v3623_v13 = vld [vmem:[%s3921_s3] ss:$0 sm:$0xff]  ;;  %v403_v48 = vld [vmem:[%s3567_s26 + $0x10] sm:$0xff]  ;;  %p390_p6 = scmp.lt.s32.totalorder %s3415_s13, 1  ;;  %s3955_s14 = sld [smem:[#allocation18_spill]] }
  0x89   : > { %2894 = vmatpush3.bf16.msra.mxu1 %v3591_v8  ;;  %2891 = vmatpush3.bf16.msra.mxu0 %v2888_v5  ;;  %v404_v49 = vld [vmem:[%s3567_s26 + $0x18] sm:$0xff]  ;;  %v405_v50 = vld [vmem:[%s3567_s26 + $0x20] sm:$0xff]  ;;  %v406_v51 = vld [vmem:[%s3567_s26 + $0x28] sm:$0xff]  ;;  %s3956_s12 = sld [smem:[#allocation19_spill]]  ;;  %vm2412_vm3 = vcmask 31744  }
  0x8a   : > { %2895 = vmatprep.subr.bf16.mxu1 %v3341_v0  ;;  %2904 = vmatprep.subr.bf16.mxu0 %v3341_v0  ;;  %v407_v52 = vld [vmem:[%s3567_s26 + $0x30] sm:$0xff]  ;;  %v408_v53 = vld [vmem:[%s3567_s26 + $0x38] sm:$0xff]  ;;  %s3963_s13 = smov (!%p390_p6, %s3415_s13), 1 }
  0x8b   : > { %s2521_s23 = sshll.u32 %s3963_s13, 3 }
  0x8c   : > { %2670 = vmatmul.mubr.msk.f32.vlgmr.msra.gmra.mrb[0].mxu0 %vm415_vm1, %v402_v11 }
  0x8d   : > { %2897 = vmatpush3.bf16.msra.mxu1 %v3602_v12  ;;  %2906 = vmatpush3.bf16.msra.mxu0 %v3591_v8 }
  0x8e   : > { %2898 = vmatprep.subr.bf16.mxu1 %v3341_v0  ;;  %2907 = vmatprep.subr.bf16.mxu0 %v3341_v0 }
  0x8f   : > { %2672 = vmatprep.mubr.msk.f32.mxu0 %vm415_vm1, %v403_v48  ;;  %s393_s15 = scalar_lea.vmem %s3956_s12, %s2521_s23 }
  0x90   : > { %2690 = vmatmul.mubr.f32.vlgmr.msra.gmra.mrb[0].mxu1 %v3343_v1  ;;  %2673 = vmatmul.mubr.msk.f32.gmra.mrb[2].mxu0 %vm415_vm1, %v404_v49 }
  0x91   : > { %2900 = vmatpush3.bf16.msra.mxu1 %v3591_v8  ;;  %2700 = vmatprep.mubr.msk.f32.mxu1 %vm3342_vm0, %v3343_v1 }
  0x92   : > { %2901 = vmatprep.subr.bf16.mxu1 %v3341_v0  ;;  %2909 = vmatpush3.bf16.msra.mxu0 %v3602_v12 }
  0x93   : > { %2916 = vmatprep.subr.bf16.mxu0 %v3341_v0  ;;  %2675 = vmatprep.mubr.msk.f32.mxu0 %vm415_vm1, %v405_v50 }
  0x94   : > { %2676 = vmatmul.mubr.msk.f32.gmra.mrb[4].mxu0 %vm415_vm1, %v406_v51 }
  0x95   : > { %2903 = vmatpush3.bf16.msra.mxu1 %v3602_v12  ;;  %2678 = vmatprep.mubr.msk.f32.mxu0 %vm415_vm1, %v407_v52 }
  0x96   : > { %2910 = vmatprep.subr.bf16.mxu1 %v3341_v0 }
  0x98   : > { %2679 = vmatmul.mubr.msk.f32.gmra.mrb[6].mxu0 %vm415_vm1, %v408_v53 }
  0x99   : > { %2711 = vmatprep.mubr.msk.f32.mxu0 %vm3342_vm0, %v3343_v1 }
 0x15f   : > { %v2671_v14 = vpop.f32.mrb[0].mxu0 }
 0x160   : > { %v506_v15 = vpop.f32.mrb[1].mxu0  ;;  %v512_v34 = vadd.f32 %v2671_v14, %v3623_v13 }
 0x161   : > { %v507_v16 = vadd.f32 %v3623_v13, %v506_v15 }
 0x163   : > { %v624_v17 = vpop.f32.mrb[0].mxu1  ;;  %v2674_v57 = vpop.f32.mrb[2].mxu0 }
 0x164   : > { %v628_v18 = vadd.f32 %v624_v17, %v507_v16  ;;  %v2691_v19 = vpop.f32.mrb[1].mxu1  ;;  %v516_v58 = vpop.f32.mrb[3].mxu0 }
 0x165   : > { %v517_v2 = vadd.f32 %v3623_v13, %v516_v58 }
 0x166   : > { %3080 = vtanh.f32 %v628_v18  ;;  %v629_v21 = vmul.f32 0.5, %v628_v18 }
 0x167   : > { %v3657_v59 = vpop.f32.mrb[4].mxu0 }
 0x168   : > { %3082 = vtanh.f32 %v629_v21  ;;  %v3659_v60 = vpop.f32.mrb[5].mxu0 }
 0x16b   : > { %v3661_v61 = vpop.f32.mrb[6].mxu0 }
 0x16c   : > { %v3663_v62 = vpop.f32.mrb[7].mxu0 }
 0x170   : > { %v3081_v20 = vpop.eup %3080 }
 0x171   : > { %636 = vrot.lane.b32.xlu0 %v3081_v20, %s3344_s27 }
 0x172   : > { %v3083_v22 = vpop.eup %3082 }
 0x173   : > { %v631_v23 = vmul.f32 0.5, %v3083_v22 }
 0x175   : > { %v632_v24 = vadd.f32 0.5, %v631_v23  ;;  %v522_v23 = vadd.f32 %v2674_v57, %v3623_v13 }
 0x177   : > { %v634_v27 = vmul.f32 0.0, %v632_v24 }
 0x1e3   : > { %v637_v25 = vpop.permute.xlu0 %636 }
 0x1e4   : > { %v639_v26 = vmul.f32 %v637_v25, %v632_v24 }
 0x1e6   : > { %641 = vrot.lane.b32.xlu0 %v639_v26, %s3344_s27 }
 0x258   : > { %v642_v28 = vpop.permute.xlu0 %641 }
 0x259   : > { %v644_v29 = vadd.f32 %v642_v28, %v634_v27 }
 0x25b   : > { %3084 = vtanh.f32 %v644_v29 }
 0x265   : > { %v3085_v30 = vpop.eup %3084 }
 0x266   : > { %647 = vrot.lane.b32.xlu1 %v3085_v30, %s3344_s27 }
 0x2d8   : > { %v648_v31 = vpop.permute.xlu1 %647 }
 0x2d9   : > { %v650_v32 = vmul.f32 %v648_v31, %v632_v24 }
 0x2db   : > { %652 = vrot.lane.b32.xlu1 %v650_v32, %s3345_s30 }
 0x34d   : > { %v653_v33 = vpop.permute.xlu1 %652 }
 0x34e   : > { %655 = vst.msk [vmem:[#allocation3] sm:$0xff] %vm554_vm2, %v653_v33  ;;  %2701 = vmatmul.mubr.msk.f32.vlgmr.msra.gmra.mrb[2].mxu1 %vm554_vm2, %v653_v33 }
 0x34f   : > { %2912 = vmatpush3.bf16.msra.mxu1 %v3591_v8  ;;  %2722 = vmatprep.mubr.msk.f32.mxu1 %vm3342_vm0, %v3343_v1 }
 0x350   : > { %2913 = vmatprep.subr.bf16.mxu1 %v3341_v0 }
 0x353   : > { %2915 = vmatpush3.bf16.msra.mxu1 %v3602_v12 }
 0x354   : > { %2922 = vmatprep.subr.bf16.mxu1 %v3341_v0 }
 0x421   : > { %v725_v35 = vpop.f32.mrb[2].mxu1 }
 0x422   : > { %v729_v36 = vadd.f32 %v725_v35, %v512_v34  ;;  %v2702_v37 = vpop.f32.mrb[3].mxu1 }
 0x424   : > { %3086 = vtanh.f32 %v729_v36  ;;  %v730_v39 = vmul.f32 0.5, %v729_v36 }
 0x426   : > { %3088 = vtanh.f32 %v730_v39 }
 0x42e   : > { %v3087_v38 = vpop.eup %3086 }
 0x42f   : > { %737 = vrot.lane.b32.xlu0 %v3087_v38, %s3344_s27 }
 0x430   : > { %v3089_v40 = vpop.eup %3088 }
 0x431   : > { %v732_v41 = vmul.f32 0.5, %v3089_v40 }
 0x433   : > { %v733_v42 = vadd.f32 0.5, %v732_v41  ;;  %v527_v41 = vadd.f32 %v3623_v13, %v3659_v60  ;;  %v532_v60 = vadd.f32 %v3657_v59, %v3623_v13  ;;  %v1363_v59 = vld [vmem:[#allocation8] sm:$0xff] }
 0x435   : > { %v735_v45 = vmul.f32 %v733_v42, %v644_v29 }
 0x4a1   : > { %v738_v43 = vpop.permute.xlu0 %737 }
 0x4a2   : > { %v740_v44 = vmul.f32 %v738_v43, %v733_v42 }
 0x4a4   : > { %742 = vrot.lane.b32.xlu1 %v740_v44, %s3344_s27 }
 0x516   : > { %v743_v46 = vpop.permute.xlu1 %742 }
 0x517   : > { %v745_v47 = vadd.f32 %v743_v46, %v735_v45 }
 0x519   : > { %3090 = vtanh.f32 %v745_v47 }
 0x523   : > { %v3091_v54 = vpop.eup %3090 }
 0x524   : > { %748 = vrot.lane.b32.xlu0 %v3091_v54, %s3344_s27 }
 0x596   : > { %v749_v55 = vpop.permute.xlu0 %748 }
 0x597   : > { %v751_v56 = vmul.f32 %v749_v55, %v733_v42 }
 0x599   : > { %753 = vrot.lane.b32.xlu1 %v751_v56, %s3345_s30 }
 0x60b   : > { %v754_v63 = vpop.permute.xlu1 %753 }
 0x60c   : > { %756 = vst.msk [vmem:[#allocation3 + $0x8] sm:$0xff] %vm554_vm2, %v754_v63  ;;  %2712 = vmatmul.mubr.msk.f32.vlgmr.msra.gmra.mrb[8].mxu0 %vm554_vm2, %v754_v63 }
 0x60d   : > { %2918 = vmatpush3.bf16.msra.mxu0 %v3591_v8  ;;  %2733 = vmatprep.mubr.msk.f32.mxu0 %vm3342_vm0, %v3343_v1 }
 0x60e   : > { %2919 = vmatprep.subr.bf16.mxu0 %v3341_v0 }
 0x611   : > { %2921 = vmatpush3.bf16.msra.mxu0 %v3602_v12 }
 0x612   : > { %2928 = vmatprep.subr.bf16.mxu0 %v3341_v0 }
 0x6df   : > { %v826_v3 = vpop.f32.mrb[8].mxu0 }
 0x6e0   : > { %v830_v4 = vadd.f32 %v826_v3, %v517_v2  ;;  %v2713_v5 = vpop.f32.mrb[9].mxu0 }
 0x6e2   : > { %3092 = vtanh.f32 %v830_v4  ;;  %v831_v7 = vmul.f32 0.5, %v830_v4 }
 0x6e4   : > { %3094 = vtanh.f32 %v831_v7 }
 0x6ec   : > { %v3093_v6 = vpop.eup %3092 }
 0x6ed   : > { %838 = vrot.lane.b32.xlu0 %v3093_v6, %s3344_s27 }
 0x6ee   : > { %v3095_v9 = vpop.eup %3094 }
 0x6ef   : > { %v833_v10 = vmul.f32 0.5, %v3095_v9 }
 0x6f1   : > { %v834_v11 = vadd.f32 0.5, %v833_v10 }
 0x6f3   : > { %v836_v16 = vmul.f32 %v834_v11, %v745_v47 }
 0x75f   : > { %v839_v14 = vpop.permute.xlu0 %838 }
 0x760   : > { %v841_v15 = vmul.f32 %v839_v14, %v834_v11 }
 0x762   : > { %843 = vrot.lane.b32.xlu1 %v841_v15, %s3344_s27  ;;  %v1364_v15 = vld [vmem:[#allocation8 + $0x8] sm:$0xff] }
 0x7d4   : > { %v844_v17 = vpop.permute.xlu1 %843 }
 0x7d5   : > { %v846_v18 = vadd.f32 %v844_v17, %v836_v16  ;;  %v2940_v16 = vpack.c.bf16 %v1364_v15, %v1363_v59 }
 0x7d7   : > { %3096 = vtanh.f32 %v846_v18 }
 0x7e1   : > { %v3097_v19 = vpop.eup %3096 }
 0x7e2   : > { %849 = vrot.lane.b32.xlu0 %v3097_v19, %s3344_s27 }
 0x854   : > { %v850_v20 = vpop.permute.xlu0 %849 }
 0x855   : > { %v852_v21 = vmul.f32 %v850_v20, %v834_v11  ;;  %v1365_v20 = vld [vmem:[#allocation8 + $0x10] sm:$0xff] }
 0x857   : > { %854 = vrot.lane.b32.xlu1 %v852_v21, %s3345_s30  ;;  %v1366_v21 = vld [vmem:[#allocation8 + $0x18] sm:$0xff] }
 0x8c9   : > { %v855_v22 = vpop.permute.xlu1 %854 }
 0x8ca   : > { %857 = vst.msk [vmem:[#allocation3 + $0x10] sm:$0xff] %vm554_vm2, %v855_v22  ;;  %2723 = vmatmul.mubr.msk.f32.vlgmr.msra.gmra.mrb[4].mxu1 %vm554_vm2, %v855_v22  ;;  %v2944_v22 = vpack.c.bf16 %v1366_v21, %v1365_v20 }
 0x8cb   : > { %2924 = vmatpush3.bf16.msra.mxu1 %v3591_v8  ;;  %2744 = vmatprep.mubr.msk.f32.mxu1 %vm3342_vm0, %v3343_v1 }
 0x8cc   : > { %2925 = vmatprep.subr.bf16.mxu1 %v3341_v0 }
 0x8cf   : > { %2927 = vmatpush3.bf16.msra.mxu1 %v3602_v12 }
 0x8d0   : > { %2934 = vmatprep.subr.bf16.mxu1 %v3341_v0 }
 0x99d   : > { %v927_v24 = vpop.f32.mrb[4].mxu1 }
 0x99e   : > { %v931_v25 = vadd.f32 %v927_v24, %v522_v23  ;;  %v2724_v26 = vpop.f32.mrb[5].mxu1  ;;  %v1372_v24 = vld [vmem:[#allocation3] sm:$0xff] }
 0x99f   : > { %v1374_v26 = vld [vmem:[#allocation3 + $0x10] sm:$0xff] }
 0x9a0   : > { %3098 = vtanh.f32 %v931_v25  ;;  %v932_v28 = vmul.f32 0.5, %v931_v25  ;;  %v1373_v25 = vld [vmem:[#allocation3 + $0x8] sm:$0xff] }
 0x9a2   : > { %3100 = vtanh.f32 %v932_v28 }
 0x9aa   : > { %v3099_v27 = vpop.eup %3098 }
 0x9ab   : > { %939 = vrot.lane.b32.xlu0 %v3099_v27, %s3344_s27 }
 0x9ac   : > { %v3101_v29 = vpop.eup %3100 }
 0x9ad   : > { %v934_v30 = vmul.f32 0.5, %v3101_v29 }
 0x9af   : > { %v935_v31 = vadd.f32 0.5, %v934_v30  ;;  %v537_v30 = vadd.f32 %v3623_v13, %v3663_v62 }
 0x9b1   : > { %v937_v34 = vmul.f32 %v935_v31, %v846_v18 }
 0xa1d   : > { %v940_v32 = vpop.permute.xlu0 %939 }
 0xa1e   : > { %v942_v33 = vmul.f32 %v940_v32, %v935_v31 }
 0xa20   : > { %944 = vrot.lane.b32.xlu1 %v942_v33, %s3344_s27 }
 0xa92   : > { %v945_v35 = vpop.permute.xlu1 %944 }
 0xa93   : > { %v947_v36 = vadd.f32 %v945_v35, %v937_v34 }
 0xa95   : > { %3102 = vtanh.f32 %v947_v36 }
 0xa9f   : > { %v3103_v37 = vpop.eup %3102 }
 0xaa0   : > { %950 = vrot.lane.b32.xlu0 %v3103_v37, %s3344_s27 }
 0xb12   : > { %v951_v38 = vpop.permute.xlu0 %950 }
 0xb13   : > { %v953_v39 = vmul.f32 %v951_v38, %v935_v31 }
 0xb15   : > { %955 = vrot.lane.b32.xlu1 %v953_v39, %s3345_s30 }
 0xb87   : > { %v956_v40 = vpop.permute.xlu1 %955 }
 0xb88   : > { %958 = vst.msk [vmem:[#allocation3 + $0x18] sm:$0xff] %vm554_vm2, %v956_v40  ;;  %2734 = vmatmul.mubr.msk.f32.vlgmr.msra.gmra.mrb[10].mxu0 %vm554_vm2, %v956_v40 }
 0xb89   : > { %2930 = vmatpush3.bf16.msra.mxu0 %v3591_v8  ;;  %2755 = vmatprep.mubr.msk.f32.mxu0 %vm3342_vm0, %v3343_v1 }
 0xb8a   : > { %2931 = vmatprep.subr.bf16.mxu0 %v3341_v0 }
 0xb8d   : > { %2933 = vmatpush3.bf16.msra.mxu0 %v3602_v12 }
 0xb8e   : > { %2941 = vmatprep.subr.bf16.mxu0 %v2940_v16 }
 0xb8f   : > { %v1375_v27 = vld [vmem:[#allocation3 + $0x18] sm:$0xff] }
 0xc5b   : > { %v1028_v42 = vpop.f32.mrb[10].mxu0 }
 0xc5c   : > { %v1032_v43 = vadd.f32 %v1028_v42, %v527_v41  ;;  %v2735_v44 = vpop.f32.mrb[11].mxu0 }
 0xc5e   : > { %3104 = vtanh.f32 %v1032_v43  ;;  %v1033_v46 = vmul.f32 0.5, %v1032_v43 }
 0xc60   : > { %3106 = vtanh.f32 %v1033_v46 }
 0xc68   : > { %v3105_v45 = vpop.eup %3104 }
 0xc69   : > { %1040 = vrot.lane.b32.xlu0 %v3105_v45, %s3344_s27 }
 0xc6a   : > { %v3107_v47 = vpop.eup %3106 }
 0xc6b   : > { %v1035_v48 = vmul.f32 0.5, %v3107_v47 }
 0xc6d   : > { %v1036_v49 = vadd.f32 0.5, %v1035_v48 }
 0xc6f   : > { %v1038_v52 = vmul.f32 %v1036_v49, %v947_v36 }
 0xcdb   : > { %v1041_v50 = vpop.permute.xlu0 %1040 }
 0xcdc   : > { %v1043_v51 = vmul.f32 %v1041_v50, %v1036_v49  ;;  %v1367_v50 = vld [vmem:[#allocation9] sm:$0xff] }
 0xcde   : > { %1045 = vrot.lane.b32.xlu1 %v1043_v51, %s3344_s27  ;;  %v1368_v51 = vld [vmem:[#allocation9 + $0x8] sm:$0xff] }
 0xd50   : > { %v1046_v53 = vpop.permute.xlu1 %1045 }
 0xd51   : > { %v1048_v54 = vadd.f32 %v1046_v53, %v1038_v52  ;;  %v3745_v52 = vpack.c.bf16 %v1368_v51, %v1367_v50  ;;  %v1369_v53 = vld [vmem:[#allocation9 + $0x10] sm:$0xff] }
 0xd53   : > { %3108 = vtanh.f32 %v1048_v54 }
 0xd5d   : > { %v3109_v55 = vpop.eup %3108 }
 0xd5e   : > { %1051 = vrot.lane.b32.xlu0 %v3109_v55, %s3344_s27 }
 0xdd0   : > { %v1052_v56 = vpop.permute.xlu0 %1051 }
 0xdd1   : > { %v1054_v57 = vmul.f32 %v1052_v56, %v1036_v49 }
 0xdd3   : > { %1056 = vrot.lane.b32.xlu1 %v1054_v57, %s3345_s30 }
 0xe45   : > { %v1057_v58 = vpop.permute.xlu1 %1056 }
 0xe46   : > { %1059 = vst.msk [vmem:[#allocation3 + $0x20] sm:$0xff] %vm554_vm2, %v1057_v58  ;;  %2745 = vmatmul.mubr.msk.f32.vlgmr.msra.gmra.mrb[6].mxu1 %vm554_vm2, %v1057_v58 }
 0xe47   : > { %2936 = vmatpush3.bf16.msra.mxu1 %v3591_v8  ;;  %2766 = vmatprep.mubr.msk.f32.mxu1 %vm3342_vm0, %v3343_v1 }
 0xe48   : > { %2937 = vmatprep.subr.bf16.mxu1 %v3341_v0 }
 0xe4b   : > { %2939 = vmatpush3.bf16.msra.mxu1 %v3602_v12 }
 0xe4c   : > { %2948 = vmatprep.subr.bf16.mxu1 %v3341_v0 }
 0xe4d   : > { %v1376_v28 = vld [vmem:[#allocation3 + $0x20] sm:$0xff] }
 0xf19   : > { %v1129_v63 = vpop.f32.mrb[6].mxu1 }
 0xf1a   : > { %v1133_v2 = vadd.f32 %v1129_v63, %v532_v60  ;;  %v2746_v3 = vpop.f32.mrb[7].mxu1  ;;  %v542_v63 = vadd.f32 %v3661_v61, %v3623_v13 }
 0xf1c   : > { %3110 = vtanh.f32 %v1133_v2  ;;  %v1134_v8 = vmul.f32 0.5, %v1133_v2 }
 0xf1e   : > { %3112 = vtanh.f32 %v1134_v8  ;;  %v3775_v8 = vld [vmem:[%s3953_s16] ss:$0 sm:$0xff] }
 0xf26   : > { %v3111_v4 = vpop.eup %3110 }
 0xf27   : > { %1141 = vrot.lane.b32.xlu0 %v3111_v4, %s3344_s27 }
 0xf28   : > { %v3113_v5 = vpop.eup %3112 }
 0xf29   : > { %v1136_v6 = vmul.f32 0.5, %v3113_v5 }
 0xf2b   : > { %v1137_v7 = vadd.f32 0.5, %v1136_v6 }
 0xf2d   : > { %v1139_v12 = vmul.f32 %v1137_v7, %v1048_v54  ;;  %v1370_v54 = vld [vmem:[#allocation9 + $0x18] sm:$0xff] }
 0xf2e   : > { %v3749_v55 = vpack.c.bf16 %v1370_v54, %v1369_v53 }
 0xf99   : > { %v1142_v9 = vpop.permute.xlu0 %1141 }
 0xf9a   : > { %v1144_v10 = vmul.f32 %v1142_v9, %v1137_v7 }
 0xf9c   : > { %1146 = vrot.lane.b32.xlu1 %v1144_v10, %s3344_s27 }
0x100e   : > { %v1147_v11 = vpop.permute.xlu1 %1146 }
0x100f   : > { %v1149_v14 = vadd.f32 %v1147_v11, %v1139_v12 }
0x1011   : > { %3114 = vtanh.f32 %v1149_v14 }
0x101b   : > { %v3115_v17 = vpop.eup %3114 }
0x101c   : > { %1152 = vrot.lane.b32.xlu0 %v3115_v17, %s3344_s27 }
0x108e   : > { %v1153_v18 = vpop.permute.xlu0 %1152 }
0x108f   : > { %v1155_v19 = vmul.f32 %v1153_v18, %v1137_v7 }
0x1091   : > { %1157 = vrot.lane.b32.xlu1 %v1155_v19, %s3345_s30 }
0x1103   : > { %v1158_v23 = vpop.permute.xlu1 %1157 }
0x1104   : > { %1160 = vst.msk [vmem:[#allocation3 + $0x28] sm:$0xff] %vm554_vm2, %v1158_v23  ;;  %2756 = vmatmul.mubr.msk.f32.vlgmr.msra.gmra.mrb[12].mxu0 %vm554_vm2, %v1158_v23 }
0x1105   : > { %2943 = vmatpush3.bf16.msra.mxu0 %v2940_v16  ;;  %2777 = vmatprep.mubr.msk.f32.mxu0 %vm554_vm2, %v1372_v24 }
0x1106   : > { %2945 = vmatprep.subr.bf16.mxu0 %v2944_v22 }
0x1109   : > { %2947 = vmatpush3.bf16.msra.mxu0 %v2944_v22 }
0x110a   : > { %2960 = vmatprep.subr.bf16.mxu0 %v3341_v0 }
0x110b   : > { %v1377_v29 = vld [vmem:[#allocation3 + $0x28] sm:$0xff] }
0x110c   : > { %2778 = vmatmul.mubr.msk.f32.vlgmr.msra.gmra.mrb[14].mxu0 %vm554_vm2, %v1373_v25 }
0x110d   : > { %2780 = vmatprep.mubr.msk.f32.mxu0 %vm554_vm2, %v1374_v26  ;;  %2962 = vmatpush3.bf16.msra.mxu0 %v3745_v52 }
0x110e   : > { %2963 = vmatprep.subr.bf16.mxu0 %v3341_v0 }
0x1110   : > { %2781 = vmatmul.mubr.msk.f32.gmra.mrb[16].mxu0 %vm554_vm2, %v1375_v27 }
0x1111   : > { %2783 = vmatprep.mubr.msk.f32.mxu0 %vm554_vm2, %v1376_v28  ;;  %2965 = vmatpush3.bf16.msra.mxu0 %v3749_v55 }
0x1112   : > { %2972 = vmatprep.subr.bf16.mxu0 %v3341_v0 }
0x1114   : > { %2784 = vmatmul.mubr.msk.f32.gmra.mrb[18].mxu0 %vm554_vm2, %v1377_v29 }
0x11d7   : > { %v1230_v31 = vpop.f32.mrb[12].mxu0 }
0x11d8   : > { %v1234_v32 = vadd.f32 %v1230_v31, %v537_v30  ;;  %v2757_v33 = vpop.f32.mrb[13].mxu0 }
0x11da   : > { %3116 = vtanh.f32 %v1234_v32  ;;  %v1235_v41 = vmul.f32 0.5, %v1234_v32 }
0x11dc   : > { %3118 = vtanh.f32 %v1235_v41 }
0x11df   : > { %v3729_v34 = vpop.f32.mrb[14].mxu0 }
0x11e0   : > { %v1476_v35 = vpop.f32.mrb[15].mxu0 }
0x11e1   : > { %v1477_v5 = vadd.f32 %v3775_v8, %v1476_v35 }
0x11e3   : > { %v3731_v36 = vpop.f32.mrb[16].mxu0 }
0x11e4   : > { %v3117_v37 = vpop.eup %3116  ;;  %v3733_v38 = vpop.f32.mrb[17].mxu0 }
0x11e5   : > { %1242 = vrot.lane.b32.xlu0 %v3117_v37, %s3344_s27  ;;  %v1482_v37 = vadd.f32 %v3729_v34, %v3775_v8 }
0x11e6   : > { %v3119_v62 = vpop.eup %3118 }
0x11e7   : > { %v3736_v39 = vpop.f32.mrb[18].mxu0  ;;  %v1237_v42 = vmul.f32 0.5, %v3119_v62 }
0x11e8   : > { %v3738_v40 = vpop.f32.mrb[19].mxu0 }
0x11e9   : > { %v1238_v43 = vadd.f32 0.5, %v1237_v42 }
0x11eb   : > { %v1240_v46 = vmul.f32 %v1238_v43, %v1149_v14 }
0x1257   : > { %v1243_v44 = vpop.permute.xlu0 %1242 }
0x1258   : > { %v1245_v45 = vmul.f32 %v1243_v44, %v1238_v43 }
0x125a   : > { %1247 = vrot.lane.b32.xlu1 %v1245_v45, %s3344_s27 }
0x12cc   : > { %v1248_v47 = vpop.permute.xlu1 %1247 }
0x12cd   : > { %v3741_v48 = vadd.f32 %v1248_v47, %v1240_v46 }
0x12cf   : > { %3120 = vtanh.f32 %v3741_v48 }
0x12d9   : > { %v3121_v49 = vpop.eup %3120 }
0x12da   : > { %1253 = vrot.lane.b32.xlu0 %v3121_v49, %s3344_s27 }
0x134c   : > { %v1254_v56 = vpop.permute.xlu0 %1253 }
0x134d   : > { %v1256_v57 = vmul.f32 %v1254_v56, %v1238_v43 }
0x134f   : > { %1258 = vrot.lane.b32.xlu1 %v1256_v57, %s3345_s30 }
0x13c1   : > { %v1259_v58 = vpop.permute.xlu1 %1258 }
0x13c2   : > { %1261 = vst.msk [vmem:[#allocation3 + $0x30] sm:$0xff] %vm554_vm2, %v1259_v58  ;;  %2767 = vmatmul.mubr.msk.f32.vlgmr.msra.gmra.mrb[8].mxu1 %vm554_vm2, %v1259_v58 }
0x13c3   : > { %2950 = vmatpush3.bf16.msra.mxu1 %v3745_v52  ;;  %2797 = vmatprep.mubr.msk.f32.mxu1 %vm3342_vm0, %v3343_v1 }
0x13c4   : > { %2951 = vmatprep.subr.bf16.mxu1 %v3341_v0 }
0x13c7   : > { %2953 = vmatpush3.bf16.msra.mxu1 %v3749_v55 }
0x13c8   : > { %2954 = vmatprep.subr.bf16.mxu1 %v3341_v0 }
0x13c9   : > { %v1378_v60 = vld [vmem:[#allocation3 + $0x30] sm:$0xff] }
0x13ca   : > { %2798 = vmatmul.mubr.f32.vlgmr.msra.gmra.mrb[10].mxu1 %v3343_v1  ;;  %2786 = vmatprep.mubr.msk.f32.mxu0 %vm554_vm2, %v1378_v60 }
0x13cb   : > { %2956 = vmatpush3.bf16.msra.mxu1 %v3745_v52  ;;  %2808 = vmatprep.mubr.msk.f32.mxu1 %vm3342_vm0, %v3343_v1 }
0x13cc   : > { %2957 = vmatprep.subr.bf16.mxu1 %v3341_v0 }
0x13cf   : > { %2959 = vmatpush3.bf16.msra.mxu1 %v3749_v55 }
0x13d0   : > { %2966 = vmatprep.subr.bf16.mxu1 %v3341_v0 }
0x1495   : > { %v1331_v2 = vpop.f32.mrb[8].mxu1 }
0x1496   : > { %v1335_v3 = vadd.f32 %v1331_v2, %v542_v63  ;;  %v2768_v4 = vpop.f32.mrb[9].mxu1 }
0x1498   : > { %v1336_v20 = vmul.f32 0.5, %v1335_v3 }
0x149d   : > { %v1590_v6 = vpop.f32.mrb[10].mxu1 }
0x149e   : > { %v1594_v7 = vadd.f32 %v1590_v6, %v1477_v5  ;;  %v2799_v9 = vpop.f32.mrb[11].mxu1 }
0x14a0   : > { %3122 = vtanh.f32 %v1594_v7  ;;  %v1595_v12 = vmul.f32 0.5, %v1594_v7 }
0x14a2   : > { %3124 = vtanh.f32 %v1595_v12 }
0x14aa   : > { %v3123_v10 = vpop.eup %3122 }
0x14ab   : > { %1602 = vrot.lane.b32.xlu0 %v3123_v10, %s3344_s27 }
0x14ac   : > { %v3125_v13 = vpop.eup %3124 }
0x14ad   : > { %v1597_v61 = vmul.f32 0.5, %v3125_v13 }
0x14af   : > { %v1598_v11 = vadd.f32 0.5, %v1597_v61 }
0x14b1   : > { %v1600_v15 = vmul.f32 0.0, %v1598_v11 }
0x151d   : > { %v1603_v14 = vpop.permute.xlu0 %1602 }
0x151e   : > { %v1605_v59 = vmul.f32 %v1603_v14, %v1598_v11 }
0x1520   : > { %1607 = vrot.lane.b32.xlu1 %v1605_v59, %s3344_s27 }
0x1592   : > { %v1608_v16 = vpop.permute.xlu1 %1607 }
0x1593   : > { %v1610_v17 = vadd.f32 %v1608_v16, %v1600_v15 }
0x1595   : > { %3126 = vtanh.f32 %v1610_v17 }
0x1596   : > { %3128 = vtanh.f32 %v1335_v3  ;;  %v1487_v3 = vadd.f32 %v3775_v8, %v3733_v38 }
0x1597   : > { %3130 = vtanh.f32 %v1336_v20 }
0x159f   : > { %v3127_v18 = vpop.eup %3126 }
0x15a0   : > { %1613 = vrot.lane.b32.xlu0 %v3127_v18, %s3344_s27  ;;  %v3129_v19 = vpop.eup %3128 }
0x15a1   : > { %v3131_v21 = vpop.eup %3130 }
0x15a2   : > { %v1338_v22 = vmul.f32 0.5, %v3131_v21 }
0x15a4   : > { %1343 = vrot.lane.b32.xlu0 %v3129_v19, %s3344_s27  ;;  %v1339_v25 = vadd.f32 0.5, %v1338_v22  ;;  %v1492_v19 = vadd.f32 %v3731_v36, %v3775_v8 }
0x15a6   : > { %v1341_v29 = vmul.f32 %v1339_v25, %v3741_v48 }
0x1612   : > { %v1614_v23 = vpop.permute.xlu0 %1613 }
0x1613   : > { %v1616_v24 = vmul.f32 %v1614_v23, %v1598_v11 }
0x1615   : > { %1618 = vrot.lane.b32.xlu1 %v1616_v24, %s3345_s30 }
0x1616   : > { %v1344_v26 = vpop.permute.xlu0 %1343 }
0x1617   : > { %v1346_v27 = vmul.f32 %v1344_v26, %v1339_v25 }
0x1619   : > { %1348 = vrot.lane.b32.xlu0 %v1346_v27, %s3344_s27 }
0x1687   : > { %v1619_v28 = vpop.permute.xlu1 %1618 }
0x1688   : > { %1621 = vst.msk [vmem:[#allocation3] sm:$0xff] %vm554_vm2, %v1619_v28  ;;  %2809 = vmatmul.mubr.msk.f32.vlgmr.msra.gmra.mrb[12].mxu1 %vm554_vm2, %v1619_v28 }
0x1689   : > { %2968 = vmatpush3.bf16.msra.mxu1 %v3745_v52  ;;  %2830 = vmatprep.mubr.msk.f32.mxu1 %vm3342_vm0, %v3343_v1 }
0x168a   : > { %2969 = vmatprep.subr.bf16.mxu1 %v3341_v0 }
0x168b   : > { %v1349_v30 = vpop.permute.xlu0 %1348 }
0x168c   : > { %v1351_v31 = vadd.f32 %v1349_v30, %v1341_v29 }
0x168d   : > { %2971 = vmatpush3.bf16.msra.mxu1 %v3749_v55 }
0x168e   : > { %3132 = vtanh.f32 %v1351_v31  ;;  %2978 = vmatprep.subr.bf16.mxu1 %v3341_v0 }
0x1698   : > { %v3133_v32 = vpop.eup %3132 }
0x1699   : > { %1354 = vrot.lane.b32.xlu0 %v3133_v32, %s3344_s27 }
0x170b   : > { %v1355_v33 = vpop.permute.xlu0 %1354 }
0x170c   : > { %v1357_v35 = vmul.f32 %v1355_v33, %v1339_v25 }
0x170e   : > { %1359 = vrot.lane.b32.xlu0 %v1357_v35, %s3345_s30 }
0x175b   : > { %v1691_v41 = vpop.f32.mrb[12].mxu1 }
0x175c   : > { %v1695_v62 = vadd.f32 %v1691_v41, %v1482_v37  ;;  %v2810_v42 = vpop.f32.mrb[13].mxu1  ;;  %v1497_v41 = vadd.f32 %v3775_v8, %v3738_v40 }
0x175e   : > { %3134 = vtanh.f32 %v1695_v62  ;;  %v1696_v46 = vmul.f32 0.5, %v1695_v62 }
0x1760   : > { %3136 = vtanh.f32 %v1696_v46 }
0x1768   : > { %v3135_v43 = vpop.eup %3134 }
0x1769   : > { %1703 = vrot.lane.b32.xlu1 %v3135_v43, %s3344_s27 }
0x176a   : > { %v3137_v47 = vpop.eup %3136 }
0x176b   : > { %v1698_v34 = vmul.f32 0.5, %v3137_v47 }
0x176d   : > { %v1699_v48 = vadd.f32 0.5, %v1698_v34 }
0x176f   : > { %v1701_v51 = vmul.f32 %v1699_v48, %v1610_v17 }
0x1780   : > { %v1360_v44 = vpop.permute.xlu0 %1359 }
0x1781   : > { %1362 = vst.msk [vmem:[#allocation3 + $0x38] sm:$0xff] %vm554_vm2, %v1360_v44 }
0x1788   : > { %v1379_v45 = vld [vmem:[#allocation3 + $0x38] sm:$0xff] }
0x1789   : > { %2787 = vmatmul.mubr.msk.f32.gmra.mrb[20].mxu0 %vm554_vm2, %v1379_v45 }
0x178a   : > { %2819 = vmatprep.mubr.msk.f32.mxu0 %vm3342_vm0, %v3343_v1 }
0x17db   : > { %v1704_v49 = vpop.permute.xlu1 %1703 }
0x17dc   : > { %v1706_v50 = vmul.f32 %v1704_v49, %v1699_v48 }
0x17de   : > { %1708 = vrot.lane.b32.xlu1 %v1706_v50, %s3344_s27 }
0x1850   : > { %v1709_v53 = vpop.permute.xlu1 %1708 }
0x1851   : > { %v1711_v54 = vadd.f32 %v1709_v53, %v1701_v51 }
0x1853   : > { %3138 = vtanh.f32 %v1711_v54 }
0x185c   : > { %v3803_v56 = vpop.f32.mrb[20].mxu0 }
0x185d   : > { %v3139_v57 = vpop.eup %3138  ;;  %v3805_v58 = vpop.f32.mrb[21].mxu0 }
0x185e   : > { %1714 = vrot.lane.b32.xlu1 %v3139_v57, %s3344_s27 }
0x18d0   : > { %v1715_v60 = vpop.permute.xlu1 %1714 }
0x18d1   : > { %v1717_v63 = vmul.f32 %v1715_v60, %v1699_v48 }
0x18d3   : > { %1719 = vrot.lane.b32.xlu1 %v1717_v63, %s3345_s30  ;;  %v1502_v63 = vadd.f32 %v3736_v39, %v3775_v8 }
0x1945   : > { %v1720_v2 = vpop.permute.xlu1 %1719 }
0x1946   : > { %1722 = vst.msk [vmem:[#allocation3 + $0x8] sm:$0xff] %vm554_vm2, %v1720_v2  ;;  %2820 = vmatmul.mubr.msk.f32.vlgmr.msra.gmra.mrb[22].mxu0 %vm554_vm2, %v1720_v2 }
0x1947   : > { %2974 = vmatpush3.bf16.msra.mxu0 %v3745_v52  ;;  %2841 = vmatprep.mubr.msk.f32.mxu0 %vm3342_vm0, %v3343_v1 }
0x1948   : > { %2975 = vmatprep.subr.bf16.mxu0 %v3341_v0 }
0x194b   : > { %2977 = vmatpush3.bf16.msra.mxu0 %v3749_v55 }
0x194c   : > { %2984 = vmatprep.subr.bf16.mxu0 %v3341_v0 }
0x1a19   : > { %v1792_v4 = vpop.f32.mrb[22].mxu0 }
0x1a1a   : > { %v1796_v5 = vadd.f32 %v1792_v4, %v1487_v3  ;;  %v2821_v6 = vpop.f32.mrb[23].mxu0 }
0x1a1c   : > { %3140 = vtanh.f32 %v1796_v5  ;;  %v1797_v9 = vmul.f32 0.5, %v1796_v5 }
0x1a1e   : > { %3142 = vtanh.f32 %v1797_v9 }
0x1a26   : > { %v3141_v7 = vpop.eup %3140 }
0x1a27   : > { %1804 = vrot.lane.b32.xlu0 %v3141_v7, %s3344_s27 }
0x1a28   : > { %v3143_v10 = vpop.eup %3142 }
0x1a29   : > { %v1799_v12 = vmul.f32 0.5, %v3143_v10 }
0x1a2b   : > { %v1800_v13 = vadd.f32 0.5, %v1799_v12 }
0x1a2d   : > { %v1802_v14 = vmul.f32 %v1800_v13, %v1711_v54 }
0x1a99   : > { %v1805_v61 = vpop.permute.xlu0 %1804 }
0x1a9a   : > { %v1807_v11 = vmul.f32 %v1805_v61, %v1800_v13 }
0x1a9c   : > { %1809 = vrot.lane.b32.xlu1 %v1807_v11, %s3344_s27 }
0x1b0e   : > { %v1810_v59 = vpop.permute.xlu1 %1809 }
0x1b0f   : > { %v1812_v15 = vadd.f32 %v1810_v59, %v1802_v14 }
0x1b11   : > { %3144 = vtanh.f32 %v1812_v15 }
0x1b1b   : > { %v3145_v38 = vpop.eup %3144 }
0x1b1c   : > { %1815 = vrot.lane.b32.xlu0 %v3145_v38, %s3344_s27 }
0x1b8e   : > { %v1816_v16 = vpop.permute.xlu0 %1815 }
0x1b8f   : > { %v1818_v17 = vmul.f32 %v1816_v16, %v1800_v13 }
0x1b91   : > { %1820 = vrot.lane.b32.xlu1 %v1818_v17, %s3345_s30 }
0x1c03   : > { %v1821_v18 = vpop.permute.xlu1 %1820 }
0x1c04   : > { %1823 = vst.msk [vmem:[#allocation3 + $0x10] sm:$0xff] %vm554_vm2, %v1821_v18  ;;  %2831 = vmatmul.mubr.msk.f32.vlgmr.msra.gmra.mrb[14].mxu1 %vm554_vm2, %v1821_v18 }
0x1c05   : > { %2980 = vmatpush3.bf16.msra.mxu1 %v3745_v52  ;;  %2852 = vmatprep.mubr.msk.f32.mxu1 %vm3342_vm0, %v3343_v1 }
0x1c06   : > { %2981 = vmatprep.subr.bf16.mxu1 %v3341_v0 }
0x1c09   : > { %2983 = vmatpush3.bf16.msra.mxu1 %v3749_v55 }
0x1c0a   : > { %2990 = vmatprep.subr.bf16.mxu1 %v3341_v0 }
0x1cd7   : > { %v1893_v20 = vpop.f32.mrb[14].mxu1 }
0x1cd8   : > { %v1897_v21 = vadd.f32 %v1893_v20, %v1492_v19  ;;  %v2832_v22 = vpop.f32.mrb[15].mxu1 }
0x1cda   : > { %3146 = vtanh.f32 %v1897_v21  ;;  %v1898_v24 = vmul.f32 0.5, %v1897_v21 }
0x1cdc   : > { %3148 = vtanh.f32 %v1898_v24 }
0x1ce4   : > { %v3147_v23 = vpop.eup %3146 }
0x1ce5   : > { %1905 = vrot.lane.b32.xlu0 %v3147_v23, %s3344_s27 }
0x1ce6   : > { %v3149_v25 = vpop.eup %3148 }
0x1ce7   : > { %v1900_v26 = vmul.f32 0.5, %v3149_v25 }
0x1ce9   : > { %v1901_v27 = vadd.f32 0.5, %v1900_v26 }
0x1ceb   : > { %v1903_v30 = vmul.f32 %v1901_v27, %v1812_v15  ;;  %v1507_v15 = vadd.f32 %v3775_v8, %v3805_v58 }
0x1d57   : > { %v1906_v28 = vpop.permute.xlu0 %1905 }
0x1d58   : > { %v1908_v29 = vmul.f32 %v1906_v28, %v1901_v27 }
0x1d5a   : > { %1910 = vrot.lane.b32.xlu1 %v1908_v29, %s3344_s27 }
0x1dcc   : > { %v1911_v31 = vpop.permute.xlu1 %1910 }
0x1dcd   : > { %v1913_v32 = vadd.f32 %v1911_v31, %v1903_v30  ;;  %v1512_v30 = vadd.f32 %v3803_v56, %v3775_v8  ;;  %v2329_v8 = vld [vmem:[%s3954_s6] sm:$0xff]  ;;  %v2330_v56 = vld [vmem:[%s3954_s6 + $0x8] sm:$0xff] }
0x1dcf   : > { %3150 = vtanh.f32 %v1913_v32 }
0x1dd9   : > { %v3151_v36 = vpop.eup %3150 }
0x1dda   : > { %1916 = vrot.lane.b32.xlu0 %v3151_v36, %s3344_s27 }
0x1e4c   : > { %v1917_v33 = vpop.permute.xlu0 %1916 }
0x1e4d   : > { %v1919_v35 = vmul.f32 %v1917_v33, %v1901_v27 }
0x1e4f   : > { %1921 = vrot.lane.b32.xlu1 %v1919_v35, %s3345_s30 }
0x1ec1   : > { %v1922_v37 = vpop.permute.xlu1 %1921 }
0x1ec2   : > { %1924 = vst.msk [vmem:[#allocation3 + $0x18] sm:$0xff] %vm554_vm2, %v1922_v37  ;;  %2842 = vmatmul.mubr.msk.f32.vlgmr.msra.gmra.mrb[24].mxu0 %vm554_vm2, %v1922_v37 }
0x1ec3   : > { %2986 = vmatpush3.bf16.msra.mxu0 %v3745_v52  ;;  %2863 = vmatprep.mubr.msk.f32.mxu0 %vm3342_vm0, %v3343_v1 }
0x1ec4   : > { %2987 = vmatprep.subr.bf16.mxu0 %v3341_v0 }
0x1ec7   : > { %2989 = vmatpush3.bf16.msra.mxu0 %v3749_v55 }
0x1ec8   : > { %2996 = vmatprep.subr.bf16.mxu0 %v3341_v0 }
0x1f95   : > { %v1994_v62 = vpop.f32.mrb[24].mxu0 }
0x1f96   : > { %v1998_v42 = vadd.f32 %v1994_v62, %v1497_v41  ;;  %v2843_v43 = vpop.f32.mrb[25].mxu0 }
0x1f98   : > { %3152 = vtanh.f32 %v1998_v42  ;;  %v1999_v45 = vmul.f32 0.5, %v1998_v42 }
0x1f9a   : > { %3154 = vtanh.f32 %v1999_v45 }
0x1fa2   : > { %v3153_v44 = vpop.eup %3152 }
0x1fa3   : > { %2006 = vrot.lane.b32.xlu0 %v3153_v44, %s3344_s27 }
0x1fa4   : > { %v3155_v46 = vpop.eup %3154 }
0x1fa5   : > { %v2001_v47 = vmul.f32 0.5, %v3155_v46 }
0x1fa7   : > { %v2002_v34 = vadd.f32 0.5, %v2001_v47  ;;  %v2331_v47 = vld [vmem:[%s3954_s6 + $0x10] sm:$0xff] }
0x1fa9   : > { %v2004_v50 = vmul.f32 %v2002_v34, %v1913_v32 }
0x2015   : > { %v2007_v48 = vpop.permute.xlu0 %2006 }
0x2016   : > { %v2009_v49 = vmul.f32 %v2007_v48, %v2002_v34  ;;  %v2332_v48 = vld [vmem:[%s3954_s6 + $0x18] sm:$0xff] }
0x2018   : > { %2011 = vrot.lane.b32.xlu1 %v2009_v49, %s3344_s27  ;;  %v3000_v49 = vpack.c.bf16 %v2332_v48, %v2331_v47 }
0x208a   : > { %v2012_v51 = vpop.permute.xlu1 %2011 }
0x208b   : > { %v2014_v53 = vadd.f32 %v2012_v51, %v2004_v50 }
0x208d   : > { %3156 = vtanh.f32 %v2014_v53 }
0x2097   : > { %v3157_v40 = vpop.eup %3156 }
0x2098   : > { %2017 = vrot.lane.b32.xlu0 %v3157_v40, %s3344_s27 }
0x210a   : > { %v2018_v54 = vpop.permute.xlu0 %2017 }
0x210b   : > { %v2020_v57 = vmul.f32 %v2018_v54, %v2002_v34  ;;  %v2997_v34 = vpack.c.bf16 %v2330_v56, %v2329_v8 }
0x210d   : > { %2022 = vrot.lane.b32.xlu1 %v2020_v57, %s3345_s30 }
0x217f   : > { %v2023_v60 = vpop.permute.xlu1 %2022 }
0x2180   : > { %2025 = vst.msk [vmem:[#allocation3 + $0x20] sm:$0xff] %vm554_vm2, %v2023_v60  ;;  %2853 = vmatmul.mubr.msk.f32.vlgmr.msra.gmra.mrb[16].mxu1 %vm554_vm2, %v2023_v60 }
0x2181   : > { %2992 = vmatpush3.bf16.msra.mxu1 %v3745_v52  ;;  %2874 = vmatprep.mubr.msk.f32.mxu1 %vm3342_vm0, %v3343_v1 }
0x2182   : > { %2993 = vmatprep.subr.bf16.mxu1 %v3341_v0 }
0x2185   : > { %2995 = vmatpush3.bf16.msra.mxu1 %v3749_v55 }
0x2253   : > { %v2095_v2 = vpop.f32.mrb[16].mxu1 }
0x2254   : > { %v2099_v3 = vadd.f32 %v2095_v2, %v1502_v63  ;;  %v2854_v4 = vpop.f32.mrb[17].mxu1 }
0x2256   : > { %3158 = vtanh.f32 %v2099_v3  ;;  %v2100_v6 = vmul.f32 0.5, %v2099_v3 }
0x2258   : > { %3160 = vtanh.f32 %v2100_v6 }
0x2260   : > { %v3159_v5 = vpop.eup %3158 }
0x2261   : > { %2107 = vrot.lane.b32.xlu0 %v3159_v5, %s3344_s27 }
0x2262   : > { %v3161_v52 = vpop.eup %3160 }
0x2263   : > { %v2102_v7 = vmul.f32 0.5, %v3161_v52 }
0x2265   : > { %v2103_v9 = vadd.f32 0.5, %v2102_v7 }
0x2267   : > { %v2105_v55 = vmul.f32 %v2103_v9, %v2014_v53 }
0x22d3   : > { %v2108_v10 = vpop.permute.xlu0 %2107 }
0x22d4   : > { %v2110_v12 = vmul.f32 %v2108_v10, %v2103_v9 }
0x22d6   : > { %2112 = vrot.lane.b32.xlu1 %v2110_v12, %s3344_s27 }
0x2348   : > { %v2113_v13 = vpop.permute.xlu1 %2112 }
0x2349   : > { %v2115_v61 = vadd.f32 %v2113_v13, %v2105_v55 }
0x234b   : > { %3162 = vtanh.f32 %v2115_v61 }
0x2355   : > { %v3163_v39 = vpop.eup %3162 }
0x2356   : > { %2118 = vrot.lane.b32.xlu0 %v3163_v39, %s3344_s27 }
0x23c8   : > { %v2119_v11 = vpop.permute.xlu0 %2118 }
0x23c9   : > { %v2121_v14 = vmul.f32 %v2119_v11, %v2103_v9 }
0x23cb   : > { %2123 = vrot.lane.b32.xlu1 %v2121_v14, %s3345_s30 }
0x243d   : > { %v2124_v59 = vpop.permute.xlu1 %2123 }
0x243e   : > { %2126 = vst.msk [vmem:[#allocation3 + $0x28] sm:$0xff] %vm554_vm2, %v2124_v59  ;;  %2864 = vmatmul.mubr.msk.f32.vlgmr.msra.gmra.mrb[26].mxu0 %vm554_vm2, %v2124_v59 }
0x243f   : > { %2885 = vmatprep.mubr.msk.f32.mxu0 %vm3342_vm0, %v3343_v1  ;;  %2998 = vmatpush3.bf16.msra.mxu0 %v2997_v34 }
0x2440   : > { %2999 = vmatprep.subr.bf16.mxu0 %v3341_v0  ;;  %v2554_v0 = vld [vmem:[%s3955_s14] ss:$0 sm:$0xff] }
0x2443   : > { %3001 = vmatpush3.bf16.msra.mxu0 %v3000_v49 }
0x2511   : > { %v2196_v38 = vpop.f32.mrb[26].mxu0 }
0x2512   : > { %v2200_v16 = vadd.f32 %v2196_v38, %v1507_v15  ;;  %v2865_v17 = vpop.f32.mrb[27].mxu0 }
0x2514   : > { %3164 = vtanh.f32 %v2200_v16  ;;  %v2201_v19 = vmul.f32 0.5, %v2200_v16 }
0x2516   : > { %3166 = vtanh.f32 %v2201_v19 }
0x251e   : > { %v3165_v18 = vpop.eup %3164 }
0x251f   : > { %2208 = vrot.lane.b32.xlu0 %v3165_v18, %s3344_s27 }
0x2520   : > { %v3167_v20 = vpop.eup %3166 }
0x2521   : > { %v2203_v21 = vmul.f32 0.5, %v3167_v20 }
0x2523   : > { %v2204_v22 = vadd.f32 0.5, %v2203_v21 }
0x2525   : > { %v2206_v1 = vmul.f32 %v2204_v22, %v2115_v61 }
0x2591   : > { %v2209_v23 = vpop.permute.xlu0 %2208 }
0x2592   : > { %v2211_v24 = vmul.f32 %v2209_v23, %v2204_v22 }
0x2594   : > { %2213 = vrot.lane.b32.xlu1 %v2211_v24, %s3344_s27 }
0x2606   : > { %v2214_v25 = vpop.permute.xlu1 %2213 }
0x2607   : > { %v2216_v26 = vadd.f32 %v2214_v25, %v2206_v1 }
0x2609   : > { %3168 = vtanh.f32 %v2216_v26 }
0x2613   : > { %v3169_v58 = vpop.eup %3168 }
0x2614   : > { %2219 = vrot.lane.b32.xlu0 %v3169_v58, %s3344_s27 }
0x2686   : > { %v2220_v27 = vpop.permute.xlu0 %2219 }
0x2687   : > { %v2222_v28 = vmul.f32 %v2220_v27, %v2204_v22 }
0x2689   : > { %2224 = vrot.lane.b32.xlu1 %v2222_v28, %s3345_s30 }
0x26fb   : > { %v2225_v29 = vpop.permute.xlu1 %2224 }
0x26fc   : > { %2227 = vst.msk [vmem:[#allocation3 + $0x30] sm:$0xff] %vm554_vm2, %v2225_v29  ;;  %2875 = vmatmul.mubr.msk.f32.vlgmr.msra.gmra.mrb[18].mxu1 %vm554_vm2, %v2225_v29 }
0x27cf   : > { %v2297_v31 = vpop.f32.mrb[18].mxu1 }
0x27d0   : > { %v2301_v32 = vadd.f32 %v2297_v31, %v1512_v30  ;;  %v2876_v36 = vpop.f32.mrb[19].mxu1 }
0x27d2   : > { %3170 = vtanh.f32 %v2301_v32  ;;  %v2302_v35 = vmul.f32 0.5, %v2301_v32 }
0x27d4   : > { %3172 = vtanh.f32 %v2302_v35 }
0x27dc   : > { %v3171_v33 = vpop.eup %3170 }
0x27dd   : > { %2309 = vrot.lane.b32.xlu0 %v3171_v33, %s3344_s27 }
0x27de   : > { %v3173_v37 = vpop.eup %3172 }
0x27df   : > { %v2304_v41 = vmul.f32 0.5, %v3173_v37 }
0x27e1   : > { %v2305_v62 = vadd.f32 0.5, %v2304_v41 }
0x27e3   : > { %v2307_v44 = vmul.f32 %v2305_v62, %v2216_v26 }
0x284f   : > { %v2310_v42 = vpop.permute.xlu0 %2309 }
0x2850   : > { %v2312_v43 = vmul.f32 %v2310_v42, %v2305_v62 }
0x2852   : > { %2314 = vrot.lane.b32.xlu1 %v2312_v43, %s3344_s27 }
0x28c4   : > { %v2315_v45 = vpop.permute.xlu1 %2314 }
0x28c5   : > { %v2317_v46 = vadd.f32 %v2315_v45, %v2307_v44 }
0x28c7   : > { %3174 = vtanh.f32 %v2317_v46 }
0x28d1   : > { %v3175_v50 = vpop.eup %3174 }
0x28d2   : > { %2320 = vrot.lane.b32.xlu0 %v3175_v50, %s3344_s27 }
0x2944   : > { %v2321_v51 = vpop.permute.xlu0 %2320 }
0x2945   : > { %v2323_v53 = vmul.f32 %v2321_v51, %v2305_v62 }
0x2947   : > { %2325 = vrot.lane.b32.xlu1 %v2323_v53, %s3345_s30 }
0x29b9   : > { %v2326_v40 = vpop.permute.xlu1 %2325 }
0x29ba   : > { %2328 = vst.msk [vmem:[#allocation3 + $0x38] sm:$0xff] %vm554_vm2, %v2326_v40  ;;  %2886 = vmatmul.mubr.msk.f32.vlgmr.msra.gmra.mrb[28].mxu0 %vm554_vm2, %v2326_v40 }
0x2a8d   : > { %v2408_v54 = vpop.f32.mrb[28].mxu0 }
0x2a8e   : > { %v2409_v57 = vadd.f32 %v2554_v0, %v2408_v54  ;;  %v2887_v60 = vpop.f32.mrb[29].mxu0 }
0x2a90   : > { %2413 = vst.msk [vmem:[%s393_s15] sm:$0xff] %vm2412_vm3, %v2409_v57 }
0x2a91 PF: > { %s3957_s12 = sld [smem:[#allocation14_spill]]  ;;  %s3958_s27 = sld [smem:[#allocation15_spill]] }
0x2a92   : > { %s3959_s30 = smov %s3324_s10  ;;  %s3960_s10 = smov %s3328_s11 }
0x2a97   : > { %p21_p7 = scmp.ge.s32.totalorder %s3957_s12, 4   ;;  %s3961_s11 = smov %s3958_s27 }
0x2a99   :  { %23 = sbr.rel (!%p21_p7) target bundleno = 10 (0xa), region = 108 }
0x2aa0   :  { %2433 = vsyncpa [#allocation5], 1 }
0x2aa1   :  { %2435 = vsyncpa [#allocation5 + $0x1], 1 }
0x2aa2   :  { %2436 = vsyncpa [#allocation7], 1 }
0x2aa3   :  { %2437 = vsyncpa [#allocation10], 1 }

</bundles_post_ra>
